<compile_context>
chip_gen: v7x
topology: tpu7x:2x2x1
jax: 0.10.0
libtpu: 0.0.40
codegen_flags: <defaults>
</compile_context>

<pallas_src>
import math

import jax
import jax.numpy as jnp
from jax.experimental import pallas as pl
from jax.experimental.pallas import tpu as pltpu


# ----------------------------- in-kernel helpers -----------------------------

def _gelu(x):
    # TODO(synk): nn.GELU() default is erf-exact; tanh approximation is used to
    # guarantee Mosaic/EUP lowering (max abs deviation ~1e-3).
    c = math.sqrt(2.0 / math.pi)
    return 0.5 * x * (1.0 + jnp.tanh(c * (x + 0.044715 * x * x * x)))


def _layernorm(x, gamma, beta, eps=1e-5):
    mu = jnp.mean(x, axis=-1, keepdims=True)
    var = jnp.mean((x - mu) ** 2, axis=-1, keepdims=True)
    return (x - mu) * jax.lax.rsqrt(var + eps) * gamma + beta


# ----------------- fused encoder layer + CLS pool + projection ----------------

def text_tower_kernel(x_ref, bias_ref,
                      wqkv_ref, bqkv_ref, wo_ref, bo_ref,
                      ln1g_ref, ln1b_ref,
                      w1_ref, b1_ref, w2_ref, b2_ref,
                      ln2g_ref, ln2b_ref,
                      wp_ref, bp_ref, wf_ref, bf_ref,
                      lng_ref, lnb_ref,
                      out_ref):
    TB, L, E = x_ref.shape
    x = x_ref[...]                                   # (TB, L, E)  f32
    x2 = x.reshape(TB * L, E)                        # flat rows for dense matmuls

    # --- fused QKV projection (single wide MXU pass, bf16 operands, f32 acc) ---
    qkv = jnp.dot(x2.astype(jnp.bfloat16), wqkv_ref[...],
                  preferred_element_type=jnp.float32) + bqkv_ref[...]   # (TB*L, 3E)
    qkv = qkv.reshape(TB, L, 3 * E)
    q = qkv[:, :, :E]
    k = qkv[:, :, E:2 * E]
    v = qkv[:, :, 2 * E:]

    # --- attention: contracted last dims, no explicit transpose ---
    scale = 1.0 / math.sqrt(E)
    scores = jnp.einsum("bqd,bkd->bqk",
                        q.astype(jnp.bfloat16), k.astype(jnp.bfloat16),
                        preferred_element_type=jnp.float32) * scale     # (TB, L, L)
    scores = scores + bias_ref[...]                  # additive mask bias (TB, 1, L)

    m = jnp.max(scores, axis=-1, keepdims=True)
    p = jnp.exp(scores - m)
    p = p * pl.reciprocal(jnp.sum(p, axis=-1, keepdims=True), approx=True)

    ctx = jnp.einsum("bqk,bkd->bqd",
                     p.astype(jnp.bfloat16), v.astype(jnp.bfloat16),
                     preferred_element_type=jnp.float32)                # (TB, L, E)
    attn_out = jnp.dot(ctx.reshape(TB * L, E).astype(jnp.bfloat16), wo_ref[...],
                       preferred_element_type=jnp.float32) + bo_ref[...]

    h = _layernorm(x2 + attn_out, ln1g_ref[...], ln1b_ref[...])         # (TB*L, E)

    # --- feed-forward ---
    ff = _gelu(jnp.dot(h.astype(jnp.bfloat16), w1_ref[...],
                       preferred_element_type=jnp.float32) + b1_ref[...])
    ff = jnp.dot(ff.astype(jnp.bfloat16), w2_ref[...],
                 preferred_element_type=jnp.float32) + b2_ref[...]
    hidden = _layernorm(h + ff, ln2g_ref[...], ln2b_ref[...])           # (TB*L, E)

    # --- CLS pooling (token 0 of each sequence) + ProjectionHead ---
    cls = hidden.reshape(TB, L, E)[:, 0, :]                             # (TB, E)

    projected = jnp.dot(cls.astype(jnp.bfloat16), wp_ref[...],
                        preferred_element_type=jnp.float32) + bp_ref[...]
    ph = _gelu(projected)
    ph = jnp.dot(ph.astype(jnp.bfloat16), wf_ref[...],
                 preferred_element_type=jnp.float32) + bf_ref[...]
    # dropout: eval-mode identity
    out_ref[...] = _layernorm(ph + projected, lng_ref[...], lnb_ref[...])


_MATMUL_WEIGHTS = ("wqkv", "wo", "w1", "w2", "wp", "wf")
_WEIGHT_ORDER = ["wqkv", "bqkv", "wo", "bo", "ln1g", "ln1b",
                 "w1", "b1", "w2", "b2", "ln2g", "ln2b",
                 "wp", "bp", "wf", "bf", "lng", "lnb"]


def text_encoder_forward(input_ids, attention_mask, params, *, batch_tile=None):
    B, L = input_ids.shape
    E = params["tok_emb"].shape[1]
    P = params["wp"].shape[1]
    # batch tile per grid step; whole batch in one step at demo sizes.
    # (For multi-step grids TB must be a multiple of 8 for the (TB, P) output
    #  block; a multi-step parallel batch axis is what shards across v7x's 2 TCs.)
    TB = B if batch_tile is None else batch_tile
    assert B % TB == 0 and (TB == B or TB % 8 == 0)

    # Embedding lookup + positional add (glue; gather stays in XLA).
    # TODO(synk): could be fused into the kernel via PrefetchScalarGridSpec +
    # pl.Element row-gather on tok_emb to save one HBM round trip of x.
    x = params["tok_emb"][input_ids] + params["pos_emb"][None, :, :]    # (B, L, E)

    # Additive attention bias precomputed once: 0 where attended, -1e9 where masked.
    attn_bias = (1.0 - attention_mask.astype(jnp.float32)).reshape(B, 1, L) * (-1e9)

    # Matmul weights shipped as bf16 (halves weight DMA bytes / VMEM); biases
    # and LayerNorm params stay f32 so all elementwise math stays f32.
    weights = [params[n].astype(jnp.bfloat16) if n in _MATMUL_WEIGHTS else params[n]
               for n in _WEIGHT_ORDER]

    def const_spec(arr):
        nd = arr.ndim
        return pl.BlockSpec(arr.shape, lambda i, _nd=nd: (0,) * _nd)

    in_specs = ([pl.BlockSpec((TB, L, E), lambda i: (i, 0, 0)),   # activations
                 pl.BlockSpec((TB, 1, L), lambda i: (i, 0, 0))]   # attention bias
                + [const_spec(w) for w in weights])               # constant-index weights

    return pl.pallas_call(
        text_tower_kernel,
        out_shape=jax.ShapeDtypeStruct((B, P), jnp.float32),
        grid=(B // TB,),
        in_specs=in_specs,
        out_specs=pl.BlockSpec((TB, P), lambda i: (i, 0)),
        compiler_params=pltpu.CompilerParams(
            dimension_semantics=("parallel",)),
    )(x, attn_bias, *weights)


# --------------------------------- params ------------------------------------

def init_params(key, vocab, L, E, H, P):
    ks = iter(jax.random.split(key, 16))

    def dense(din, dout):
        return jax.random.normal(next(ks), (din, dout), jnp.float32) * 0.02

    p = {}
    p["tok_emb"] = jax.random.normal(next(ks), (vocab, E), jnp.float32) * 0.02
    p["pos_emb"] = jax.random.normal(next(ks), (L, E), jnp.float32) * 0.02
    # encoder layer; Q/K/V fused into one (E, 3E) weight
    wq, wk, wv = dense(E, E), dense(E, E), dense(E, E)
    p["wqkv"] = jnp.concatenate([wq, wk, wv], axis=1)
    p["bqkv"] = jnp.zeros((1, 3 * E), jnp.float32)
    p["wo"], p["bo"] = dense(E, E), jnp.zeros((1, E), jnp.float32)
    p["ln1g"], p["ln1b"] = jnp.ones((1, E), jnp.float32), jnp.zeros((1, E), jnp.float32)
    p["w1"], p["b1"] = dense(E, H), jnp.zeros((1, H), jnp.float32)
    p["w2"], p["b2"] = dense(H, E), jnp.zeros((1, E), jnp.float32)
    p["ln2g"], p["ln2b"] = jnp.ones((1, E), jnp.float32), jnp.zeros((1, E), jnp.float32)
    # projection head (Linear stored as (in, out) == W^T of torch's (out, in))
    p["wp"], p["bp"] = dense(E, P), jnp.zeros((1, P), jnp.float32)
    p["wf"], p["bf"] = dense(P, P), jnp.zeros((1, P), jnp.float32)
    p["lng"], p["lnb"] = jnp.ones((1, P), jnp.float32), jnp.zeros((1, P), jnp.float32)
    return p


if __name__ == "__main__":
    B, L = 2, 8
    embedding_dim, projection_dim = 128, 128       # lane-dense (multiples of 128)
    vocab, ffn_hidden = 512, 4 * embedding_dim

    key = jax.random.PRNGKey(0)
    k_params, k_ids = jax.random.split(key)
    params = init_params(k_params, vocab, L, embedding_dim, ffn_hidden, projection_dim)

    input_ids = jax.random.randint(k_ids, (B, L), 0, vocab, dtype=jnp.int32)
    attention_mask = jnp.ones((B, L), jnp.int32).at[1, 6:].set(0)  # ragged second row

    text_embedding = text_encoder_forward(input_ids, attention_mask, params)
    jax.block_until_ready(text_embedding)
    assert text_embedding.shape == (B, projection_dim)
    assert bool(jnp.all(jnp.isfinite(text_embedding)))
    print("KERNEL_OK")
</pallas_src>

<mosaic_0001>
module attributes {stable_mosaic.version = 11 : i64} {
  func.func @text_tower_kernel(%arg0: i32, %arg1: memref<2x8x128xf32, #tpu.memory_space<vmem>>, %arg2: memref<2x1x8xf32, #tpu.memory_space<vmem>>, %arg3: memref<128x384xbf16, #tpu.memory_space<vmem>>, %arg4: memref<1x384xf32, #tpu.memory_space<vmem>>, %arg5: memref<128x128xbf16, #tpu.memory_space<vmem>>, %arg6: memref<1x128xf32, #tpu.memory_space<vmem>>, %arg7: memref<1x128xf32, #tpu.memory_space<vmem>>, %arg8: memref<1x128xf32, #tpu.memory_space<vmem>>, %arg9: memref<128x512xbf16, #tpu.memory_space<vmem>>, %arg10: memref<1x512xf32, #tpu.memory_space<vmem>>, %arg11: memref<512x128xbf16, #tpu.memory_space<vmem>>, %arg12: memref<1x128xf32, #tpu.memory_space<vmem>>, %arg13: memref<1x128xf32, #tpu.memory_space<vmem>>, %arg14: memref<1x128xf32, #tpu.memory_space<vmem>>, %arg15: memref<128x128xbf16, #tpu.memory_space<vmem>>, %arg16: memref<1x128xf32, #tpu.memory_space<vmem>>, %arg17: memref<128x128xbf16, #tpu.memory_space<vmem>>, %arg18: memref<1x128xf32, #tpu.memory_space<vmem>>, %arg19: memref<1x128xf32, #tpu.memory_space<vmem>>, %arg20: memref<1x128xf32, #tpu.memory_space<vmem>>, %arg21: memref<2x128xf32, #tpu.memory_space<vmem>>) attributes {dimension_semantics = [#tpu.dimension_semantics<parallel>], iteration_bounds = array<i64: 1>, scalar_prefetch = 0 : i64, scratch_operands = 0 : i64, tpu.core_type = #tpu.core_type<tc>, window_params = [{transform_indices = @transform_0, window_bounds = array<i64: 2, 8, 128>}, {transform_indices = @transform_1, window_bounds = array<i64: 2, 1, 8>}, {pipeline_mode = #tpu.pipeline_mode<synchronous>, transform_indices = @transform_2, window_bounds = array<i64: 128, 384>}, {pipeline_mode = #tpu.pipeline_mode<synchronous>, transform_indices = @transform_3, window_bounds = array<i64: 1, 384>}, {pipeline_mode = #tpu.pipeline_mode<synchronous>, transform_indices = @transform_4, window_bounds = array<i64: 128, 128>}, {pipeline_mode = #tpu.pipeline_mode<synchronous>, transform_indices = @transform_5, window_bounds = array<i64: 1, 128>}, {pipeline_mode = #tpu.pipeline_mode<synchronous>, transform_indices = @transform_6, window_bounds = array<i64: 1, 128>}, {pipeline_mode = #tpu.pipeline_mode<synchronous>, transform_indices = @transform_7, window_bounds = array<i64: 1, 128>}, {pipeline_mode = #tpu.pipeline_mode<synchronous>, transform_indices = @transform_8, window_bounds = array<i64: 128, 512>}, {pipeline_mode = #tpu.pipeline_mode<synchronous>, transform_indices = @transform_9, window_bounds = array<i64: 1, 512>}, {pipeline_mode = #tpu.pipeline_mode<synchronous>, transform_indices = @transform_10, window_bounds = array<i64: 512, 128>}, {pipeline_mode = #tpu.pipeline_mode<synchronous>, transform_indices = @transform_11, window_bounds = array<i64: 1, 128>}, {pipeline_mode = #tpu.pipeline_mode<synchronous>, transform_indices = @transform_12, window_bounds = array<i64: 1, 128>}, {pipeline_mode = #tpu.pipeline_mode<synchronous>, transform_indices = @transform_13, window_bounds = array<i64: 1, 128>}, {pipeline_mode = #tpu.pipeline_mode<synchronous>, transform_indices = @transform_14, window_bounds = array<i64: 128, 128>}, {pipeline_mode = #tpu.pipeline_mode<synchronous>, transform_indices = @transform_15, window_bounds = array<i64: 1, 128>}, {pipeline_mode = #tpu.pipeline_mode<synchronous>, transform_indices = @transform_16, window_bounds = array<i64: 128, 128>}, {pipeline_mode = #tpu.pipeline_mode<synchronous>, transform_indices = @transform_17, window_bounds = array<i64: 1, 128>}, {pipeline_mode = #tpu.pipeline_mode<synchronous>, transform_indices = @transform_18, window_bounds = array<i64: 1, 128>}, {pipeline_mode = #tpu.pipeline_mode<synchronous>, transform_indices = @transform_19, window_bounds = array<i64: 1, 128>}, {transform_indices = @transform_20, window_bounds = array<i64: 2, 128>}]} {
    %c0 = arith.constant 0 : index
    %c0_0 = arith.constant 0 : index
    %c0_1 = arith.constant 0 : index
    %0 = vector.load %arg1[%c0, %c0_0, %c0_1] : memref<2x8x128xf32, #tpu.memory_space<vmem>>, vector<2x8x128xf32>
    %1 = vector.shape_cast %0 : vector<2x8x128xf32> to vector<16x128xf32>
    %2 = arith.truncf %1 : vector<16x128xf32> to vector<16x128xbf16>
    %c0_2 = arith.constant 0 : index
    %c0_3 = arith.constant 0 : index
    %3 = vector.load %arg3[%c0_2, %c0_3] : memref<128x384xbf16, #tpu.memory_space<vmem>>, vector<128x384xbf16>
    %cst = arith.constant dense<0.000000e+00> : vector<16x384xf32>
    %4 = tpu.matmul %2, %3, %cst {dimension_numbers = #tpu.dot_dimension_numbers<[1], [0], [0], [1], [0, 0, 1, 1], [], []>} : vector<16x128xbf16>, vector<128x384xbf16>, vector<16x384xf32> -> vector<16x384xf32>
    %c0_4 = arith.constant 0 : index
    %c0_5 = arith.constant 0 : index
    %5 = vector.load %arg4[%c0_4, %c0_5] : memref<1x384xf32, #tpu.memory_space<vmem>>, vector<1x384xf32>
    %6 = vector.broadcast %5 : vector<1x384xf32> to vector<16x384xf32>
    %7 = arith.addf %4, %6 : vector<16x384xf32>
    %8 = vector.shape_cast %7 : vector<16x384xf32> to vector<2x8x384xf32>
    %9 = vector.extract_strided_slice %8 {offsets = [0, 0, 0], sizes = [2, 8, 128], strides = [1, 1, 1]} : vector<2x8x384xf32> to vector<2x8x128xf32>
    %10 = vector.extract_strided_slice %8 {offsets = [0, 0, 128], sizes = [2, 8, 128], strides = [1, 1, 1]} : vector<2x8x384xf32> to vector<2x8x128xf32>
    %11 = vector.extract_strided_slice %8 {offsets = [0, 0, 256], sizes = [2, 8, 128], strides = [1, 1, 1]} : vector<2x8x384xf32> to vector<2x8x128xf32>
    %12 = arith.truncf %9 : vector<2x8x128xf32> to vector<2x8x128xbf16>
    %13 = arith.truncf %10 : vector<2x8x128xf32> to vector<2x8x128xbf16>
    "tpu.trace_start"() <{level = 10 : i32, message = "bqd,bkd->bqk"}> : () -> ()
    %cst_6 = arith.constant dense<0.000000e+00> : vector<2x8x8xf32>
    %14 = tpu.matmul %12, %13, %cst_6 {dimension_numbers = #tpu.dot_dimension_numbers<[2], [2], [1], [1], [0, 0, 0, 1, 1, 1], [0], [0]>} : vector<2x8x128xbf16>, vector<2x8x128xbf16>, vector<2x8x8xf32> -> vector<2x8x8xf32>
    "tpu.trace_stop"() : () -> ()
    %cst_7 = arith.constant 0.0883883461 : f32
    %15 = vector.broadcast %cst_7 : f32 to vector<2x8x8xf32>
    %16 = arith.mulf %14, %15 : vector<2x8x8xf32>
    %c0_8 = arith.constant 0 : index
    %c0_9 = arith.constant 0 : index
    %c0_10 = arith.constant 0 : index
    %17 = vector.load %arg2[%c0_8, %c0_9, %c0_10] : memref<2x1x8xf32, #tpu.memory_space<vmem>>, vector<2x1x8xf32>
    %18 = vector.broadcast %17 : vector<2x1x8xf32> to vector<2x8x8xf32>
    %19 = arith.addf %16, %18 : vector<2x8x8xf32>
    %cst_11 = arith.constant dense<0xFF800000> : vector<2x8xf32>
    %20 = vector.multi_reduction <maximumf>, %19, %cst_11 [2] : vector<2x8x8xf32> to vector<2x8xf32>
    %21 = vector.shape_cast %20 : vector<2x8xf32> to vector<2x8x1xf32>
    %22 = vector.broadcast %21 : vector<2x8x1xf32> to vector<2x8x8xf32>
    %23 = arith.subf %19, %22 : vector<2x8x8xf32>
    %24 = math.exp %23 : vector<2x8x8xf32>
    %cst_12 = arith.constant dense<0.000000e+00> : vector<2x8xf32>
    %25 = vector.multi_reduction <add>, %24, %cst_12 [2] : vector<2x8x8xf32> to vector<2x8xf32>
    %26 = vector.shape_cast %25 : vector<2x8xf32> to vector<2x8x1xf32>
    %27 = tpu.reciprocal %26 {approx = true} : vector<2x8x1xf32> -> vector<2x8x1xf32>
    %28 = vector.broadcast %27 : vector<2x8x1xf32> to vector<2x8x8xf32>
    %29 = arith.mulf %24, %28 : vector<2x8x8xf32>
    %30 = arith.truncf %29 : vector<2x8x8xf32> to vector<2x8x8xbf16>
    %31 = arith.truncf %11 : vector<2x8x128xf32> to vector<2x8x128xbf16>
    "tpu.trace_start"() <{level = 10 : i32, message = "bqk,bkd->bqd"}> : () -> ()
    %cst_13 = arith.constant dense<0.000000e+00> : vector<2x8x128xf32>
    %32 = tpu.matmul %30, %31, %cst_13 {dimension_numbers = #tpu.dot_dimension_numbers<[2], [1], [1], [2], [0, 0, 0, 1, 1, 2], [0], [0]>} : vector<2x8x8xbf16>, vector<2x8x128xbf16>, vector<2x8x128xf32> -> vector<2x8x128xf32>
    "tpu.trace_stop"() : () -> ()
    %33 = vector.shape_cast %32 : vector<2x8x128xf32> to vector<16x128xf32>
    %34 = arith.truncf %33 : vector<16x128xf32> to vector<16x128xbf16>
    %c0_14 = arith.constant 0 : index
    %c0_15 = arith.constant 0 : index
    %35 = vector.load %arg5[%c0_14, %c0_15] : memref<128x128xbf16, #tpu.memory_space<vmem>>, vector<128x128xbf16>
    %cst_16 = arith.constant dense<0.000000e+00> : vector<16x128xf32>
    %36 = tpu.matmul %34, %35, %cst_16 {dimension_numbers = #tpu.dot_dimension_numbers<[1], [0], [0], [1], [0, 0, 1, 1], [], []>} : vector<16x128xbf16>, vector<128x128xbf16>, vector<16x128xf32> -> vector<16x128xf32>
    %c0_17 = arith.constant 0 : index
    %c0_18 = arith.constant 0 : index
    %37 = vector.load %arg6[%c0_17, %c0_18] : memref<1x128xf32, #tpu.memory_space<vmem>>, vector<1x128xf32>
    %38 = vector.broadcast %37 : vector<1x128xf32> to vector<16x128xf32>
    %39 = arith.addf %36, %38 : vector<16x128xf32>
    %40 = arith.addf %1, %39 : vector<16x128xf32>
    %c0_19 = arith.constant 0 : index
    %c0_20 = arith.constant 0 : index
    %41 = vector.load %arg7[%c0_19, %c0_20] : memref<1x128xf32, #tpu.memory_space<vmem>>, vector<1x128xf32>
    %c0_21 = arith.constant 0 : index
    %c0_22 = arith.constant 0 : index
    %42 = vector.load %arg8[%c0_21, %c0_22] : memref<1x128xf32, #tpu.memory_space<vmem>>, vector<1x128xf32>
    %cst_23 = arith.constant dense<0.000000e+00> : vector<16xf32>
    %43 = vector.multi_reduction <add>, %40, %cst_23 [1] : vector<16x128xf32> to vector<16xf32>
    %44 = vector.shape_cast %43 : vector<16xf32> to vector<16x1xf32>
    %cst_24 = arith.constant 1.280000e+02 : f32
    %45 = vector.broadcast %cst_24 : f32 to vector<16x1xf32>
    %46 = arith.divf %44, %45 : vector<16x1xf32>
    %47 = vector.broadcast %46 : vector<16x1xf32> to vector<16x128xf32>
    %48 = arith.subf %40, %47 : vector<16x128xf32>
    %49 = arith.mulf %48, %48 : vector<16x128xf32>
    %cst_25 = arith.constant dense<0.000000e+00> : vector<16xf32>
    %50 = vector.multi_reduction <add>, %49, %cst_25 [1] : vector<16x128xf32> to vector<16xf32>
    %51 = vector.shape_cast %50 : vector<16xf32> to vector<16x1xf32>
    %cst_26 = arith.constant 1.280000e+02 : f32
    %52 = vector.broadcast %cst_26 : f32 to vector<16x1xf32>
    %53 = arith.divf %51, %52 : vector<16x1xf32>
    %54 = vector.broadcast %46 : vector<16x1xf32> to vector<16x128xf32>
    %55 = arith.subf %40, %54 : vector<16x128xf32>
    %cst_27 = arith.constant 9.99999974E-6 : f32
    %56 = vector.broadcast %cst_27 : f32 to vector<16x1xf32>
    %57 = arith.addf %53, %56 : vector<16x1xf32>
    %58 = math.rsqrt %57 : vector<16x1xf32>
    %59 = vector.broadcast %58 : vector<16x1xf32> to vector<16x128xf32>
    %60 = arith.mulf %55, %59 : vector<16x128xf32>
    %61 = vector.broadcast %41 : vector<1x128xf32> to vector<16x128xf32>
    %62 = arith.mulf %60, %61 : vector<16x128xf32>
    %63 = vector.broadcast %42 : vector<1x128xf32> to vector<16x128xf32>
    %64 = arith.addf %62, %63 : vector<16x128xf32>
    %65 = arith.truncf %64 : vector<16x128xf32> to vector<16x128xbf16>
    %c0_28 = arith.constant 0 : index
    %c0_29 = arith.constant 0 : index
    %66 = vector.load %arg9[%c0_28, %c0_29] : memref<128x512xbf16, #tpu.memory_space<vmem>>, vector<128x512xbf16>
    %cst_30 = arith.constant dense<0.000000e+00> : vector<16x512xf32>
    %67 = tpu.matmul %65, %66, %cst_30 {dimension_numbers = #tpu.dot_dimension_numbers<[1], [0], [0], [1], [0, 0, 1, 1], [], []>} : vector<16x128xbf16>, vector<128x512xbf16>, vector<16x512xf32> -> vector<16x512xf32>
    %c0_31 = arith.constant 0 : index
    %c0_32 = arith.constant 0 : index
    %68 = vector.load %arg10[%c0_31, %c0_32] : memref<1x512xf32, #tpu.memory_space<vmem>>, vector<1x512xf32>
    %69 = vector.broadcast %68 : vector<1x512xf32> to vector<16x512xf32>
    %70 = arith.addf %67, %69 : vector<16x512xf32>
    %cst_33 = arith.constant 5.000000e-01 : f32
    %71 = vector.broadcast %cst_33 : f32 to vector<16x512xf32>
    %72 = arith.mulf %71, %70 : vector<16x512xf32>
    %cst_34 = arith.constant 4.471500e-02 : f32
    %73 = vector.broadcast %cst_34 : f32 to vector<16x512xf32>
    %74 = arith.mulf %73, %70 : vector<16x512xf32>
    %75 = arith.mulf %74, %70 : vector<16x512xf32>
    %76 = arith.mulf %75, %70 : vector<16x512xf32>
    %77 = arith.addf %70, %76 : vector<16x512xf32>
    %cst_35 = arith.constant 0.797884583 : f32
    %78 = vector.broadcast %cst_35 : f32 to vector<16x512xf32>
    %79 = arith.mulf %78, %77 : vector<16x512xf32>
    %80 = math.tanh %79 : vector<16x512xf32>
    %cst_36 = arith.constant 1.000000e+00 : f32
    %81 = vector.broadcast %cst_36 : f32 to vector<16x512xf32>
    %82 = arith.addf %81, %80 : vector<16x512xf32>
    %83 = arith.mulf %72, %82 : vector<16x512xf32>
    %84 = arith.truncf %83 : vector<16x512xf32> to vector<16x512xbf16>
    %c0_37 = arith.constant 0 : index
    %c0_38 = arith.constant 0 : index
    %85 = vector.load %arg11[%c0_37, %c0_38] : memref<512x128xbf16, #tpu.memory_space<vmem>>, vector<512x128xbf16>
    %cst_39 = arith.constant dense<0.000000e+00> : vector<16x128xf32>
    %86 = tpu.matmul %84, %85, %cst_39 {dimension_numbers = #tpu.dot_dimension_numbers<[1], [0], [0], [1], [0, 0, 1, 1], [], []>} : vector<16x512xbf16>, vector<512x128xbf16>, vector<16x128xf32> -> vector<16x128xf32>
    %c0_40 = arith.constant 0 : index
    %c0_41 = arith.constant 0 : index
    %87 = vector.load %arg12[%c0_40, %c0_41] : memref<1x128xf32, #tpu.memory_space<vmem>>, vector<1x128xf32>
    %88 = vector.broadcast %87 : vector<1x128xf32> to vector<16x128xf32>
    %89 = arith.addf %86, %88 : vector<16x128xf32>
    %90 = arith.addf %64, %89 : vector<16x128xf32>
    %c0_42 = arith.constant 0 : index
    %c0_43 = arith.constant 0 : index
    %91 = vector.load %arg13[%c0_42, %c0_43] : memref<1x128xf32, #tpu.memory_space<vmem>>, vector<1x128xf32>
    %c0_44 = arith.constant 0 : index
    %c0_45 = arith.constant 0 : index
    %92 = vector.load %arg14[%c0_44, %c0_45] : memref<1x128xf32, #tpu.memory_space<vmem>>, vector<1x128xf32>
    %cst_46 = arith.constant dense<0.000000e+00> : vector<16xf32>
    %93 = vector.multi_reduction <add>, %90, %cst_46 [1] : vector<16x128xf32> to vector<16xf32>
    %94 = vector.shape_cast %93 : vector<16xf32> to vector<16x1xf32>
    %cst_47 = arith.constant 1.280000e+02 : f32
    %95 = vector.broadcast %cst_47 : f32 to vector<16x1xf32>
    %96 = arith.divf %94, %95 : vector<16x1xf32>
    %97 = vector.broadcast %96 : vector<16x1xf32> to vector<16x128xf32>
    %98 = arith.subf %90, %97 : vector<16x128xf32>
    %99 = arith.mulf %98, %98 : vector<16x128xf32>
    %cst_48 = arith.constant dense<0.000000e+00> : vector<16xf32>
    %100 = vector.multi_reduction <add>, %99, %cst_48 [1] : vector<16x128xf32> to vector<16xf32>
    %101 = vector.shape_cast %100 : vector<16xf32> to vector<16x1xf32>
    %cst_49 = arith.constant 1.280000e+02 : f32
    %102 = vector.broadcast %cst_49 : f32 to vector<16x1xf32>
    %103 = arith.divf %101, %102 : vector<16x1xf32>
    %104 = vector.broadcast %96 : vector<16x1xf32> to vector<16x128xf32>
    %105 = arith.subf %90, %104 : vector<16x128xf32>
    %cst_50 = arith.constant 9.99999974E-6 : f32
    %106 = vector.broadcast %cst_50 : f32 to vector<16x1xf32>
    %107 = arith.addf %103, %106 : vector<16x1xf32>
    %108 = math.rsqrt %107 : vector<16x1xf32>
    %109 = vector.broadcast %108 : vector<16x1xf32> to vector<16x128xf32>
    %110 = arith.mulf %105, %109 : vector<16x128xf32>
    %111 = vector.broadcast %91 : vector<1x128xf32> to vector<16x128xf32>
    %112 = arith.mulf %110, %111 : vector<16x128xf32>
    %113 = vector.broadcast %92 : vector<1x128xf32> to vector<16x128xf32>
    %114 = arith.addf %112, %113 : vector<16x128xf32>
    %115 = vector.shape_cast %114 : vector<16x128xf32> to vector<2x8x128xf32>
    %116 = vector.extract_strided_slice %115 {offsets = [0, 0, 0], sizes = [2, 1, 128], strides = [1, 1, 1]} : vector<2x8x128xf32> to vector<2x1x128xf32>
    %117 = vector.shape_cast %116 : vector<2x1x128xf32> to vector<2x128xf32>
    %118 = arith.truncf %117 : vector<2x128xf32> to vector<2x128xbf16>
    %c0_51 = arith.constant 0 : index
    %c0_52 = arith.constant 0 : index
    %119 = vector.load %arg15[%c0_51, %c0_52] : memref<128x128xbf16, #tpu.memory_space<vmem>>, vector<128x128xbf16>
    %cst_53 = arith.constant dense<0.000000e+00> : vector<2x128xf32>
    %120 = tpu.matmul %118, %119, %cst_53 {dimension_numbers = #tpu.dot_dimension_numbers<[1], [0], [0], [1], [0, 0, 1, 1], [], []>} : vector<2x128xbf16>, vector<128x128xbf16>, vector<2x128xf32> -> vector<2x128xf32>
    %c0_54 = arith.constant 0 : index
    %c0_55 = arith.constant 0 : index
    %121 = vector.load %arg16[%c0_54, %c0_55] : memref<1x128xf32, #tpu.memory_space<vmem>>, vector<1x128xf32>
    %122 = vector.broadcast %121 : vector<1x128xf32> to vector<2x128xf32>
    %123 = arith.addf %120, %122 : vector<2x128xf32>
    %cst_56 = arith.constant 5.000000e-01 : f32
    %124 = vector.broadcast %cst_56 : f32 to vector<2x128xf32>
    %125 = arith.mulf %124, %123 : vector<2x128xf32>
    %cst_57 = arith.constant 4.471500e-02 : f32
    %126 = vector.broadcast %cst_57 : f32 to vector<2x128xf32>
    %127 = arith.mulf %126, %123 : vector<2x128xf32>
    %128 = arith.mulf %127, %123 : vector<2x128xf32>
    %129 = arith.mulf %128, %123 : vector<2x128xf32>
    %130 = arith.addf %123, %129 : vector<2x128xf32>
    %cst_58 = arith.constant 0.797884583 : f32
    %131 = vector.broadcast %cst_58 : f32 to vector<2x128xf32>
    %132 = arith.mulf %131, %130 : vector<2x128xf32>
    %133 = math.tanh %132 : vector<2x128xf32>
    %cst_59 = arith.constant 1.000000e+00 : f32
    %134 = vector.broadcast %cst_59 : f32 to vector<2x128xf32>
    %135 = arith.addf %134, %133 : vector<2x128xf32>
    %136 = arith.mulf %125, %135 : vector<2x128xf32>
    %137 = arith.truncf %136 : vector<2x128xf32> to vector<2x128xbf16>
    %c0_60 = arith.constant 0 : index
    %c0_61 = arith.constant 0 : index
    %138 = vector.load %arg17[%c0_60, %c0_61] : memref<128x128xbf16, #tpu.memory_space<vmem>>, vector<128x128xbf16>
    %cst_62 = arith.constant dense<0.000000e+00> : vector<2x128xf32>
    %139 = tpu.matmul %137, %138, %cst_62 {dimension_numbers = #tpu.dot_dimension_numbers<[1], [0], [0], [1], [0, 0, 1, 1], [], []>} : vector<2x128xbf16>, vector<128x128xbf16>, vector<2x128xf32> -> vector<2x128xf32>
    %c0_63 = arith.constant 0 : index
    %c0_64 = arith.constant 0 : index
    %140 = vector.load %arg18[%c0_63, %c0_64] : memref<1x128xf32, #tpu.memory_space<vmem>>, vector<1x128xf32>
    %141 = vector.broadcast %140 : vector<1x128xf32> to vector<2x128xf32>
    %142 = arith.addf %139, %141 : vector<2x128xf32>
    %143 = arith.addf %142, %123 : vector<2x128xf32>
    %c0_65 = arith.constant 0 : index
    %c0_66 = arith.constant 0 : index
    %144 = vector.load %arg19[%c0_65, %c0_66] : memref<1x128xf32, #tpu.memory_space<vmem>>, vector<1x128xf32>
    %c0_67 = arith.constant 0 : index
    %c0_68 = arith.constant 0 : index
    %145 = vector.load %arg20[%c0_67, %c0_68] : memref<1x128xf32, #tpu.memory_space<vmem>>, vector<1x128xf32>
    %cst_69 = arith.constant dense<0.000000e+00> : vector<2xf32>
    %146 = vector.multi_reduction <add>, %143, %cst_69 [1] : vector<2x128xf32> to vector<2xf32>
    %147 = vector.shape_cast %146 : vector<2xf32> to vector<2x1xf32>
    %cst_70 = arith.constant 1.280000e+02 : f32
    %148 = vector.broadcast %cst_70 : f32 to vector<2x1xf32>
    %149 = arith.divf %147, %148 : vector<2x1xf32>
    %150 = vector.broadcast %149 : vector<2x1xf32> to vector<2x128xf32>
    %151 = arith.subf %143, %150 : vector<2x128xf32>
    %152 = arith.mulf %151, %151 : vector<2x128xf32>
    %cst_71 = arith.constant dense<0.000000e+00> : vector<2xf32>
    %153 = vector.multi_reduction <add>, %152, %cst_71 [1] : vector<2x128xf32> to vector<2xf32>
    %154 = vector.shape_cast %153 : vector<2xf32> to vector<2x1xf32>
    %cst_72 = arith.constant 1.280000e+02 : f32
    %155 = vector.broadcast %cst_72 : f32 to vector<2x1xf32>
    %156 = arith.divf %154, %155 : vector<2x1xf32>
    %157 = vector.broadcast %149 : vector<2x1xf32> to vector<2x128xf32>
    %158 = arith.subf %143, %157 : vector<2x128xf32>
    %cst_73 = arith.constant 9.99999974E-6 : f32
    %159 = vector.broadcast %cst_73 : f32 to vector<2x1xf32>
    %160 = arith.addf %156, %159 : vector<2x1xf32>
    %161 = math.rsqrt %160 : vector<2x1xf32>
    %162 = vector.broadcast %161 : vector<2x1xf32> to vector<2x128xf32>
    %163 = arith.mulf %158, %162 : vector<2x128xf32>
    %164 = vector.broadcast %144 : vector<1x128xf32> to vector<2x128xf32>
    %165 = arith.mulf %163, %164 : vector<2x128xf32>
    %166 = vector.broadcast %145 : vector<1x128xf32> to vector<2x128xf32>
    %167 = arith.addf %165, %166 : vector<2x128xf32>
    %c0_74 = arith.constant 0 : index
    %c0_75 = arith.constant 0 : index
    %168 = vector.load %arg21[%c0_74, %c0_75] : memref<2x128xf32, #tpu.memory_space<vmem>>, vector<2x128xf32>
    tpu.vector_store %arg21[%c0_74, %c0_75], %167 {strides = array<i32>} : memref<2x128xf32, #tpu.memory_space<vmem>>, vector<2x128xf32>,
    return
  }
  func.func @transform_0(%arg0: i32) -> (i32, i32, i32) {
    %c0_i32 = arith.constant 0 : i32
    %c0_i32_0 = arith.constant 0 : i32
    %c0_i32_1 = arith.constant 0 : i32
    return %arg0, %c0_i32, %c0_i32_0 : i32, i32, i32
  }
  func.func @transform_1(%arg0: i32) -> (i32, i32, i32) {
    %c0_i32 = arith.constant 0 : i32
    %c0_i32_0 = arith.constant 0 : i32
    %c0_i32_1 = arith.constant 0 : i32
    return %arg0, %c0_i32, %c0_i32_0 : i32, i32, i32
  }
  func.func @transform_2(%arg0: i32) -> (i32, i32) {
    %c0_i32 = arith.constant 0 : i32
    %c0_i32_0 = arith.constant 0 : i32
    %c0_i32_1 = arith.constant 0 : i32
    return %c0_i32, %c0_i32_0 : i32, i32
  }
  func.func @transform_3(%arg0: i32) -> (i32, i32) {
    %c0_i32 = arith.constant 0 : i32
    %c0_i32_0 = arith.constant 0 : i32
    %c0_i32_1 = arith.constant 0 : i32
    return %c0_i32, %c0_i32_0 : i32, i32
  }
  func.func @transform_4(%arg0: i32) -> (i32, i32) {
    %c0_i32 = arith.constant 0 : i32
    %c0_i32_0 = arith.constant 0 : i32
    %c0_i32_1 = arith.constant 0 : i32
    return %c0_i32, %c0_i32_0 : i32, i32
  }
  func.func @transform_5(%arg0: i32) -> (i32, i32) {
    %c0_i32 = arith.constant 0 : i32
    %c0_i32_0 = arith.constant 0 : i32
    %c0_i32_1 = arith.constant 0 : i32
    return %c0_i32, %c0_i32_0 : i32, i32
  }
  func.func @transform_6(%arg0: i32) -> (i32, i32) {
    %c0_i32 = arith.constant 0 : i32
    %c0_i32_0 = arith.constant 0 : i32
    %c0_i32_1 = arith.constant 0 : i32
    return %c0_i32, %c0_i32_0 : i32, i32
  }
  func.func @transform_7(%arg0: i32) -> (i32, i32) {
    %c0_i32 = arith.constant 0 : i32
    %c0_i32_0 = arith.constant 0 : i32
    %c0_i32_1 = arith.constant 0 : i32
    return %c0_i32, %c0_i32_0 : i32, i32
  }
  func.func @transform_8(%arg0: i32) -> (i32, i32) {
    %c0_i32 = arith.constant 0 : i32
    %c0_i32_0 = arith.constant 0 : i32
    %c0_i32_1 = arith.constant 0 : i32
    return %c0_i32, %c0_i32_0 : i32, i32
  }
  func.func @transform_9(%arg0: i32) -> (i32, i32) {
    %c0_i32 = arith.constant 0 : i32
    %c0_i32_0 = arith.constant 0 : i32
    %c0_i32_1 = arith.constant 0 : i32
    return %c0_i32, %c0_i32_0 : i32, i32
  }
  func.func @transform_10(%arg0: i32) -> (i32, i32) {
    %c0_i32 = arith.constant 0 : i32
    %c0_i32_0 = arith.constant 0 : i32
    %c0_i32_1 = arith.constant 0 : i32
    return %c0_i32, %c0_i32_0 : i32, i32
  }
  func.func @transform_11(%arg0: i32) -> (i32, i32) {
    %c0_i32 = arith.constant 0 : i32
    %c0_i32_0 = arith.constant 0 : i32
    %c0_i32_1 = arith.constant 0 : i32
    return %c0_i32, %c0_i32_0 : i32, i32
  }
  func.func @transform_12(%arg0: i32) -> (i32, i32) {
    %c0_i32 = arith.constant 0 : i32
    %c0_i32_0 = arith.constant 0 : i32
    %c0_i32_1 = arith.constant 0 : i32
    return %c0_i32, %c0_i32_0 : i32, i32
  }
  func.func @transform_13(%arg0: i32) -> (i32, i32) {
    %c0_i32 = arith.constant 0 : i32
    %c0_i32_0 = arith.constant 0 : i32
    %c0_i32_1 = arith.constant 0 : i32
    return %c0_i32, %c0_i32_0 : i32, i32
  }
  func.func @transform_14(%arg0: i32) -> (i32, i32) {
    %c0_i32 = arith.constant 0 : i32
    %c0_i32_0 = arith.constant 0 : i32
    %c0_i32_1 = arith.constant 0 : i32
    return %c0_i32, %c0_i32_0 : i32, i32
  }
  func.func @transform_15(%arg0: i32) -> (i32, i32) {
    %c0_i32 = arith.constant 0 : i32
    %c0_i32_0 = arith.constant 0 : i32
    %c0_i32_1 = arith.constant 0 : i32
    return %c0_i32, %c0_i32_0 : i32, i32
  }
  func.func @transform_16(%arg0: i32) -> (i32, i32) {
    %c0_i32 = arith.constant 0 : i32
    %c0_i32_0 = arith.constant 0 : i32
    %c0_i32_1 = arith.constant 0 : i32
    return %c0_i32, %c0_i32_0 : i32, i32
  }
  func.func @transform_17(%arg0: i32) -> (i32, i32) {
    %c0_i32 = arith.constant 0 : i32
    %c0_i32_0 = arith.constant 0 : i32
    %c0_i32_1 = arith.constant 0 : i32
    return %c0_i32, %c0_i32_0 : i32, i32
  }
  func.func @transform_18(%arg0: i32) -> (i32, i32) {
    %c0_i32 = arith.constant 0 : i32
    %c0_i32_0 = arith.constant 0 : i32
    %c0_i32_1 = arith.constant 0 : i32
    return %c0_i32, %c0_i32_0 : i32, i32
  }
  func.func @transform_19(%arg0: i32) -> (i32, i32) {
    %c0_i32 = arith.constant 0 : i32
    %c0_i32_0 = arith.constant 0 : i32
    %c0_i32_1 = arith.constant 0 : i32
    return %c0_i32, %c0_i32_0 : i32, i32
  }
  func.func @transform_20(%arg0: i32) -> (i32, i32) {
    %c0_i32 = arith.constant 0 : i32
    %c0_i32_0 = arith.constant 0 : i32
    return %arg0, %c0_i32 : i32, i32
  }
}

</mosaic_0001>

<bundles_post_ra>
// kernel: tpu_custom_call.1
= control target key start
LH: loop header
LB: loop body
LE: loop exit
PB: predicated region body
PF: predicated region fallthrough
CT: control target
= control target key end

     0   :  { %s3036_s0 = inlined_call_operand.hbm [shape: f32[2,8,128], index: 0, kind: input, shape index: {}]   ;;  %s3037_s1 = inlined_call_operand.hbm [shape: f32[2,1,8], index: 1, kind: input, shape index: {}]   ;;  %s3038_s2 = inlined_call_operand.hbm [shape: bf16[128,384], index: 2, kind: input, shape index: {}]   ;;  %s3039_s3 = inlined_call_operand.vmem [shape: f32[1,384], index: 3, kind: input, shape index: {}]   ;;  %s3040_s4 = inlined_call_operand.hbm [shape: bf16[128,128], index: 4, kind: input, shape index: {}]   ;;  %s3041_s5 = inlined_call_operand.vmem [shape: f32[1,128], index: 5, kind: input, shape index: {}]   ;;  %s3042_s6 = inlined_call_operand.vmem [shape: f32[1,128], index: 6, kind: input, shape index: {}]   ;;  %s3043_s7 = inlined_call_operand.vmem [shape: f32[1,128], index: 7, kind: input, shape index: {}]   ;;  %s3044_s8 = inlined_call_operand.hbm [shape: bf16[128,512], index: 8, kind: input, shape index: {}]   ;;  %s3045_s9 = inlined_call_operand.vmem [shape: f32[1,512], index: 9, kind: input, shape index: {}]   ;;  %s3046_s10 = inlined_call_operand.hbm [shape: bf16[512,128], index: 10, kind: input, shape index: {}]   ;;  %s3047_s11 = inlined_call_operand.vmem [shape: f32[1,128], index: 11, kind: input, shape index: {}]   ;;  %s3048_s12 = inlined_call_operand.vmem [shape: f32[1,128], index: 12, kind: input, shape index: {}]   ;;  %s3049_s13 = inlined_call_operand.vmem [shape: f32[1,128], index: 13, kind: input, shape index: {}]   ;;  %s3050_s14 = inlined_call_operand.hbm [shape: bf16[128,128], index: 14, kind: input, shape index: {}]   ;;  %s3051_s15 = inlined_call_operand.vmem [shape: f32[1,128], index: 15, kind: input, shape index: {}]   ;;  %s3052_s16 = inlined_call_operand.hbm [shape: bf16[128,128], index: 16, kind: input, shape index: {}]   ;;  %s3053_s17 = inlined_call_operand.vmem [shape: f32[1,128], index: 17, kind: input, shape index: {}]   ;;  %s3054_s18 = inlined_call_operand.vmem [shape: f32[1,128], index: 18, kind: input, shape index: {}]   ;;  %s3055_s19 = inlined_call_operand.vmem [shape: f32[1,128], index: 19, kind: input, shape index: {}]   ;;  %s3056_s20 = inlined_call_operand.hbm [shape: f32[2,128], index: 20, kind: output, shape index: {}]  }
   0x1   :  { %3065 = sst [smem:[#allocation23_spill]] %s3036_s0 }
   0x2   :  { %3066 = sst [smem:[#allocation24_spill]] %s3037_s1 }
   0x3   :  { %3067 = sst [smem:[#allocation25_spill]] %s3038_s2 }
   0x4   :  { %3068 = sst [smem:[#allocation26_spill]] %s3039_s3 }
   0x5   :  { %3069 = sst [smem:[#allocation27_spill]] %s3040_s4 }
   0x6   :  { %3070 = sst [smem:[#allocation28_spill]] %s3055_s19 }
   0x7   :  { %3071 = sst [smem:[#allocation29_spill]] %s3056_s20 }
   0x8   :  { %25 = vsyncpa [#allocation3], 0 }
   0x9   :  { %26 = vsyncpa [#allocation6], 0 }
   0xa   :  { %27 = vsyncpa [#allocation9], 0 }
   0xb   :  { %28 = vsyncpa [#allocation12], 0 }
   0xc   :  { %29 = vsyncpa [#allocation15], 0 }
   0xd   :  { %30 = vsyncpa [#allocation4], 0  ;;  %s2597_s1 = smov [#allocation5]   ;;  %s3072_s2 = sld [smem:[#allocation24_spill]] }
   0xe   :  { %s48_s22 = sshll.u32 %s2597_s1, 4  ;;  %s49_s22 = int_to_ptr.vmem [resolvable:$true] %s48_s22 }
  0x13   :  { %s2387_s25 = scalar_lea.hbm %s3072_s2, 32 }
  0x14   :  { %p2388_p0 = scmp.ne.s32.totalorder %s3072_s2, %s2387_s25  ;;  %p2391_p1 = scmp.lt.u32.totalorder %s2387_s25, %s3072_s2 }
  0x16   :  { %p2393_p2 = pnand %p2391_p1, %p2388_p0 }
  0x18   :  { %2396 = shalt.err (!%p2393_p2)
}
  0x19   :  { %s2397_s4 = scalar_lea.vmem %s49_s22, 32  ;;  %p2402_p4 = scmp.lt.s32.totalorder %s49_s22, %s49_s22 }
  0x1a   :  { %p2398_p3 = scmp.ne.s32.totalorder %s49_s22, %s2397_s4  ;;  %p2403_p5 = scmp.lt.s32.totalorder %s2397_s4, %s2397_s4 }
  0x1c   :  { %p2404_p6 = por %p2403_p5, %p2402_p4 }
  0x1e   :  { %p2405_p7 = pnand %p2404_p6, %p2398_p3 }
  0x20   :  { %2408 = shalt.err (!%p2405_p7)
}
  0x21   :  { %s3062_s29 = smov 16   ;;  %s2599_s30 = smov 1  }
  0x22   :  { %54 = dma.hbm_to_vmem [thread:$0]  %s3072_s2, 32, %s49_s22, [#allocation6], %s3062_s29, %s3062_s29, %s2599_s30  }
  0x23   :  { %s2600_s1 = smov [#allocation8]   ;;  %s3073_s3 = sld [smem:[#allocation27_spill]] }
  0x24   :  { %s74_s23 = sshll.u32 %s2600_s1, 4  ;;  %s75_s23 = int_to_ptr.vmem [resolvable:$true] %s74_s23 }
  0x29   :  { %s2409_s26 = scalar_lea.hbm %s3073_s3, 1024 }
  0x2a   :  { %p2410_p8 = scmp.ne.s32.totalorder %s3073_s3, %s2409_s26  ;;  %p2413_p9 = scmp.lt.u32.totalorder %s2409_s26, %s3073_s3 }
  0x2c   :  { %p2415_p10 = pnand %p2413_p9, %p2410_p8 }
  0x2e   :  { %2418 = shalt.err (!%p2415_p10)
}
  0x2f   :  { %s2419_s19 = scalar_lea.vmem %s75_s23, 1024  ;;  %p2424_p12 = scmp.lt.s32.totalorder %s75_s23, %s75_s23 }
  0x30   :  { %p2420_p11 = scmp.ne.s32.totalorder %s75_s23, %s2419_s19  ;;  %p2425_p13 = scmp.lt.s32.totalorder %s2419_s19, %s2419_s19 }
  0x32   :  { %p2426_p0 = por %p2425_p13, %p2424_p12 }
  0x34   :  { %p2427_p1 = pnand %p2426_p0, %p2420_p11 }
  0x36   :  { %2430 = shalt.err (!%p2427_p1)
}
  0x37   :  { %s3063_s22 = smov 64   ;;  %s2602_s2 = smov 4  }
  0x38   :  { %80 = dma.hbm_to_vmem [thread:$0]  %s3073_s3, 1024, %s75_s23, [#allocation9], %s3063_s22, %s3063_s22, %s2602_s2  }
  0x39   :  { %s2603_s20 = smov [#allocation11]   ;;  %s2604_s1 = smov [#allocation2]  }
  0x3a   :  { %s106_s21 = sshll.u32 %s2603_s20, 4  ;;  %s36_s24 = sshll.u32 %s2604_s1, 4  ;;  %s107_s21 = int_to_ptr.vmem [resolvable:$true] %s106_s21  ;;  %s2752_s24 = int_to_ptr.vmem [resolvable:$true] %s36_s24 }
  0x3b   :  { %s2431_s26 = scalar_lea.hbm %s3046_s10, 4096 }
  0x3c   :  { %p2432_p2 = scmp.ne.s32.totalorder %s3046_s10, %s2431_s26  ;;  %p2435_p3 = scmp.lt.u32.totalorder %s2431_s26, %s3046_s10 }
  0x3e   :  { %p2437_p4 = pnand %p2435_p3, %p2432_p2 }
  0x40   :  { %2440 = shalt.err (!%p2437_p4)
}
  0x41   :  { %s2441_s23 = scalar_lea.vmem %s107_s21, 4096  ;;  %p2446_p6 = scmp.lt.s32.totalorder %s107_s21, %s107_s21 }
  0x42   :  { %p2442_p5 = scmp.ne.s32.totalorder %s107_s21, %s2441_s23  ;;  %p2447_p7 = scmp.lt.s32.totalorder %s2441_s23, %s2441_s23 }
  0x44   :  { %p2448_p8 = por %p2447_p7, %p2446_p6 }
  0x46   :  { %p2449_p9 = pnand %p2448_p8, %p2442_p5 }
  0x48   :  { %2452 = shalt.err (!%p2449_p9)
}
  0x49   :  { %112 = dma.hbm_to_vmem [thread:$0]  %s3046_s10, 4096, %s107_s21, [#allocation12], %s3063_s22, %s3063_s22, %s2602_s2  }
  0x4a   :  { %s3074_s29 = sld [smem:[#allocation23_spill]] }
  0x50   :  { %s2453_s1 = scalar_lea.hbm %s3074_s29, 256 }
  0x51   :  { %p2454_p10 = scmp.ne.s32.totalorder %s3074_s29, %s2453_s1  ;;  %p2457_p11 = scmp.lt.u32.totalorder %s2453_s1, %s3074_s29 }
  0x53   :  { %p2459_p12 = pnand %p2457_p11, %p2454_p10 }
  0x55   :  { %2462 = shalt.err (!%p2459_p12)
}
  0x56   :  { %s2463_s28 = scalar_lea.vmem %s2752_s24, 256  ;;  %p2468_p0 = scmp.lt.s32.totalorder %s2752_s24, %s2752_s24 }
  0x57   :  { %p2464_p13 = scmp.ne.s32.totalorder %s2752_s24, %s2463_s28  ;;  %p2469_p1 = scmp.lt.s32.totalorder %s2463_s28, %s2463_s28 }
  0x59   :  { %p2470_p2 = por %p2469_p1, %p2468_p0 }
  0x5b   :  { %p2471_p3 = pnand %p2470_p2, %p2464_p13 }
  0x5d   :  { %2474 = shalt.err (!%p2471_p3)
}
  0x5e   :  { %s2605_s10 = smov 128   ;;  %s2606_s21 = smov 8  }
  0x5f   :  { %42 = dma.hbm_to_vmem [thread:$0]  %s3074_s29, 256, %s2752_s24, [#allocation3], %s2605_s10, %s2605_s10, %s2606_s21  }
  0x60   :  { %s2607_s3 = smov [#allocation7]   ;;  %s3075_s1 = sld [smem:[#allocation25_spill]] }
  0x61   :  { %s60_s30 = sshll.u32 %s2607_s3, 4  ;;  %s61_s30 = int_to_ptr.vmem [resolvable:$true] %s60_s30 }
  0x66   :  { %s2475_s19 = scalar_lea.hbm %s3075_s1, 3072 }
  0x67   :  { %p2476_p4 = scmp.ne.s32.totalorder %s3075_s1, %s2475_s19  ;;  %p2479_p5 = scmp.lt.u32.totalorder %s2475_s19, %s3075_s1 }
  0x69   :  { %p2481_p6 = pnand %p2479_p5, %p2476_p4 }
  0x6b   :  { %2484 = shalt.err (!%p2481_p6)
}
  0x6c   :  { %s2485_s22 = scalar_lea.vmem %s61_s30, 3072  ;;  %p2490_p8 = scmp.lt.s32.totalorder %s61_s30, %s61_s30 }
  0x6d   :  { %p2486_p7 = scmp.ne.s32.totalorder %s61_s30, %s2485_s22  ;;  %p2491_p9 = scmp.lt.s32.totalorder %s2485_s22, %s2485_s22 }
  0x6f   :  { %p2492_p10 = por %p2491_p9, %p2490_p8 }
  0x71   :  { %p2493_p11 = pnand %p2492_p10, %p2486_p7 }
  0x73   :  { %2496 = shalt.err (!%p2493_p11)
}
  0x74   :  { %s2608_s24 = smov 192   ;;  %s2609_s29 = smov 12  }
  0x75   :  { %66 = dma.hbm_to_vmem [thread:$0]  %s3075_s1, 3072, %s61_s30, [#allocation6], %s2608_s24, %s2608_s24, %s2609_s29  }
  0x76   :  { %s2610_s4 = smov [#allocation10]   ;;  %s2497_s20 = scalar_lea.hbm %s3044_s8, 4096 }
  0x77   :  { %s92_s23 = sshll.u32 %s2610_s4, 4  ;;  %p2498_p12 = scmp.ne.s32.totalorder %s3044_s8, %s2497_s20  ;;  %s93_s23 = int_to_ptr.vmem [resolvable:$true] %s92_s23 }
  0x78   :  { %p2501_p13 = scmp.lt.u32.totalorder %s2497_s20, %s3044_s8 }
  0x7a   :  { %p2503_p0 = pnand %p2501_p13, %p2498_p12 }
  0x7c   :  { %2506 = shalt.err (!%p2503_p0)
}
  0x7d   :  { %s2507_s27 = scalar_lea.vmem %s93_s23, 4096  ;;  %p2512_p2 = scmp.lt.s32.totalorder %s93_s23, %s93_s23 }
  0x7e   :  { %p2508_p1 = scmp.ne.s32.totalorder %s93_s23, %s2507_s27  ;;  %p2513_p3 = scmp.lt.s32.totalorder %s2507_s27, %s2507_s27 }
  0x80   :  { %p2514_p4 = por %p2513_p3, %p2512_p2 }
  0x82   :  { %p2515_p5 = pnand %p2514_p4, %p2508_p1 }
  0x84   :  { %2518 = shalt.err (!%p2515_p5)
}
  0x85   :  { %s2611_s30 = smov 256   ;;  %s3076_s1 = smov 16  }
  0x86   :  { %98 = dma.hbm_to_vmem [thread:$0]  %s3044_s8, 4096, %s93_s23, [#allocation9], %s2611_s30, %s2611_s30, %s3076_s1  }
  0x87   :  { %s2612_s29 = smov [#allocation13]   ;;  %s2613_s21 = smov [#allocation14]  }
  0x88   :  { %s124_s10 = sshll.u32 %s2612_s29, 4  ;;  %s138_s4 = sshll.u32 %s2613_s21, 4  ;;  %s125_s10 = int_to_ptr.vmem [resolvable:$true] %s124_s10  ;;  %s139_s4 = int_to_ptr.vmem [resolvable:$true] %s138_s4 }
  0x89   :  { %s2519_s20 = scalar_lea.hbm %s3050_s14, 1024 }
  0x8a   :  { %p2520_p6 = scmp.ne.s32.totalorder %s3050_s14, %s2519_s20  ;;  %p2523_p7 = scmp.lt.u32.totalorder %s2519_s20, %s3050_s14 }
  0x8c   :  { %p2525_p8 = pnand %p2523_p7, %p2520_p6 }
  0x8e   :  { %2528 = shalt.err (!%p2525_p8)
}
  0x8f   :  { %s2529_s8 = scalar_lea.vmem %s125_s10, 1024  ;;  %p2534_p10 = scmp.lt.s32.totalorder %s125_s10, %s125_s10 }
  0x90   :  { %p2530_p9 = scmp.ne.s32.totalorder %s125_s10, %s2529_s8  ;;  %p2535_p11 = scmp.lt.s32.totalorder %s2529_s8, %s2529_s8 }
  0x92   :  { %p2536_p12 = por %p2535_p11, %p2534_p10 }
  0x94   :  { %p2537_p13 = pnand %p2536_p12, %p2530_p9 }
  0x96   :  { %2540 = shalt.err (!%p2537_p13)
}
  0x97   :  { %s3077_s23 = smov 64   ;;  %s2541_s24 = scalar_lea.hbm %s3052_s16, 1024 }
  0x98   :  { %130 = dma.hbm_to_vmem [thread:$0]  %s3050_s14, 1024, %s125_s10, [#allocation12], %s3077_s23, %s3077_s23, %s2602_s2  }
  0x99   :  { %p2542_p0 = scmp.ne.s32.totalorder %s3052_s16, %s2541_s24  ;;  %p2545_p1 = scmp.lt.u32.totalorder %s2541_s24, %s3052_s16 }
  0x9b   :  { %p2547_p2 = pnand %p2545_p1, %p2542_p0 }
  0x9d   :  { %2550 = shalt.err (!%p2547_p2)
}
  0x9e   :  { %s2551_s20 = scalar_lea.vmem %s139_s4, 1024  ;;  %p2556_p4 = scmp.lt.s32.totalorder %s139_s4, %s139_s4 }
  0x9f   :  { %p2552_p3 = scmp.ne.s32.totalorder %s139_s4, %s2551_s20  ;;  %p2557_p5 = scmp.lt.s32.totalorder %s2551_s20, %s2551_s20 }
  0xa1   :  { %p2558_p6 = por %p2557_p5, %p2556_p4 }
  0xa3   :  { %p2559_p7 = pnand %p2558_p6, %p2552_p3 }
  0xa5   :  { %2562 = shalt.err (!%p2559_p7)
}
  0xa6   :  { %144 = dma.hbm_to_vmem [thread:$0]  %s3052_s16, 1024, %s139_s4, [#allocation15], %s3077_s23, %s3077_s23, %s2602_s2  }
  0xa7   :  { %2585 = dma.done.wait [#allocation3], 256  }
  0xa8   :  { %2586 = vsyncadd [#allocation3], 4294967040 }
  0xa9   :  { %2587 = dma.done.wait [#allocation6], 3104  }
  0xaa   :  { %2588 = vsyncadd [#allocation6], 4294964192 }
  0xab   :  { %2589 = dma.done.wait [#allocation9], 5120  }
  0xac   :  { %2590 = vsyncadd [#allocation9], 4294962176 }
  0xad   :  { %2591 = dma.done.wait [#allocation12], 5120  }
  0xae   :  { %2592 = vsyncadd [#allocation12], 4294962176 }
  0xaf   :  { %2593 = dma.done.wait [#allocation15], 1024  }
  0xb0   :  { %2594 = vsyncadd [#allocation15], 4294966272  ;;  %v2614_v0 = vmov 0   ;;  %v2615_v1 = vmov 0.0   ;;  %v2215_v2 = vld [vmem:[#allocation7 + $0x4] ss:$12 sps:$4 sm:$0xff]   ;;  %v213_v29 = vlaneseq }
  0xb1   :  { %388 = vmatprep.mubr.bf16.mxu0 %v2614_v0  ;;  %2090 = vmatprep.subr.bf16.mxu1 %v2615_v1  ;;  %v2217_v3 = vld [vmem:[#allocation7] ss:$12 sps:$4 sm:$0xff]   ;;  %v2218_v4 = vld [vmem:[#allocation7 + $0x1c] ss:$12 sps:$4 sm:$0xff]   ;;  %v2220_v5 = vld [vmem:[#allocation7 + $0x18] ss:$12 sps:$4 sm:$0xff]  }
  0xb2   :  { %356 = vmatprep.subr.bf16.mxu0 %v2215_v2  ;;  %v2221_v6 = vld [vmem:[#allocation7 + $0x34] ss:$12 sps:$4 sm:$0xff]   ;;  %v2223_v7 = vld [vmem:[#allocation7 + $0x30] ss:$12 sps:$4 sm:$0xff]   ;;  %v2224_v8 = vld [vmem:[#allocation7 + $0x4c] ss:$12 sps:$4 sm:$0xff]  }
  0xb3   :  { %357 = vmatpush1.bf16.msra.mxu0 %v2217_v3  ;;  %v2226_v9 = vld [vmem:[#allocation7 + $0x48] ss:$12 sps:$4 sm:$0xff]   ;;  %v2227_v10 = vld [vmem:[#allocation7 + $0x64] ss:$12 sps:$4 sm:$0xff]   ;;  %v2240_v12 = vld [vmem:[#allocation7 + $0x20] ss:$12 sps:$4 sm:$0xff]  }
  0xb4   :  { %358 = vmatprep.subr.bf16.mxu0 %v2218_v4  ;;  %v2239_v11 = vld [vmem:[#allocation7 + $0x8] ss:$12 sps:$4 sm:$0xff]   ;;  %v2229_v13 = vld [vmem:[#allocation7 + $0x60] ss:$12 sps:$4 sm:$0xff]   ;;  %v2241_v15 = vld [vmem:[#allocation7 + $0x38] ss:$12 sps:$4 sm:$0xff]  }
  0xb5   :  { %2091 = vmatpush3.bf16.msra.mxu1 %v2239_v11  ;;  %v2230_v14 = vld [vmem:[#allocation7 + $0x7c] ss:$12 sps:$4 sm:$0xff]   ;;  %v2232_v16 = vld [vmem:[#allocation7 + $0x78] ss:$12 sps:$4 sm:$0xff]   ;;  %v2233_v17 = vld [vmem:[#allocation7 + $0x94] ss:$12 sps:$4 sm:$0xff]  }
  0xb6   :  { %2092 = vmatprep.subr.bf16.mxu1 %v2615_v1  ;;  %v2242_v18 = vld [vmem:[#allocation7 + $0x50] ss:$12 sps:$4 sm:$0xff]   ;;  %v2236_v20 = vld [vmem:[#allocation7 + $0xac] ss:$12 sps:$4 sm:$0xff]   ;;  %v2243_v21 = vld [vmem:[#allocation7 + $0x68] ss:$12 sps:$4 sm:$0xff]  }
  0xb7   :  { %359 = vmatpush1.bf16.msra.mxu0 %v2220_v5  ;;  %v2235_v19 = vld [vmem:[#allocation7 + $0x90] ss:$12 sps:$4 sm:$0xff]   ;;  %v2238_v22 = vld [vmem:[#allocation7 + $0xa8] ss:$12 sps:$4 sm:$0xff]   ;;  %v2244_v25 = vld [vmem:[#allocation7 + $0x80] ss:$12 sps:$4 sm:$0xff]  }
  0xb8   :  { %360 = vmatprep.subr.bf16.mxu0 %v2221_v6  ;;  %v2846_v23 = vld [vmem:[#allocation2] sm:$0xff]  ;;  %v2848_v24 = vld [vmem:[#allocation2 + $0x8] sm:$0xff]  ;;  %vm2616_vm0 = vmmov 0   ;;  %v2864_v30 = vshrl.u32 %v213_v29, 7  ;;  %s3078_s4 = sld [smem:[#allocation26_spill]]  ;;  %vm572_vm1 = vcmask 1043456  }
  0xb9   :  { %2093 = vmatpush3.bf16.msra.mxu1 %v2240_v12  ;;  %v178_v26 = vpack.c.bf16 %v2848_v24, %v2846_v23  ;;  %v2245_v27 = vld [vmem:[#allocation7 + $0x98] ss:$12 sps:$4 sm:$0xff]   ;;  %v2246_v28 = vld [vmem:[#allocation7 + $0xb0] ss:$12 sps:$4 sm:$0xff]   ;;  %2106 = vmatprep.mubr.msk.bf16.mxu1 %vm2616_vm0, %v2615_v1  ;;  %vm542_vm2 = vcmask 64512   ;;  %vm1612_vm3 = vcmask 1041409  }
  0xba   :  { %2094 = vmatprep.subr.bf16.mxu1 %v2615_v1  ;;  %v219_v31 = vsub.s32 1, %v2864_v30  ;;  %v215_v34 = vsub.s32 0, %v2864_v30  ;;  %v223_v48 = vsub.s32 2, %v2864_v30  ;;  %v1900_v61 = vld [vmem:[#allocation5] ss:$0 sm:$0xff]  ;;  %vm1828_vm4 = vcmask 1041408  }
  0xbb   :  { %361 = vmatpush1.bf16.msra.mxu0 %v2223_v7  ;;  %v1901_v7 = vld [vmem:[#allocation5 + $0x1] ss:$0 sm:$0xff]  ;;  %s3079_s3 = sld [smem:[#allocation28_spill]]  ;;  %s2617_s0 = smov [#allocation16]  }
  0xbc   :  { %362 = vmatprep.subr.bf16.mxu0 %v2224_v8  ;;  %v2250_v29 = vld [vmem:[#allocation8 + $0x18] sm:$0xff]   ;;  %s1863_s20 = sshll.u32 %s2617_s0, 4  ;;  %s1864_s20 = int_to_ptr.vmem [resolvable:$true] %s1863_s20 }
  0xbd   :  { %2095 = vmatpush3.bf16.msra.mxu1 %v2241_v15  ;;  %s2563_s14 = scalar_lea.vmem %s1864_s20, 32  ;;  %p2568_p9 = scmp.lt.s32.totalorder %s1864_s20, %s1864_s20 }
  0xbe   :  { %2096 = vmatprep.subr.bf16.mxu1 %v2615_v1  ;;  %v211_v32 = vld [vmem:[%s3078_s4] sm:$0x7]  ;;  %p2564_p8 = scmp.ne.s32.totalorder %s1864_s20, %s2563_s14  ;;  %p2569_p10 = scmp.lt.s32.totalorder %s2563_s14, %s2563_s14 }
  0xbf   :  { %363 = vmatpush1.bf16.msra.mxu0 %v2226_v9  ;;  %v220_v33 = vrot.slane %v211_v32, %v219_v31  ;;  %v216_v39 = vrot.slane %v211_v32, %v215_v34  ;;  %v224_v49 = vrot.slane %v211_v32, %v223_v48  ;;  %v2251_v32 = vld [vmem:[#allocation8 + $0x20] sm:$0xff]  }
  0xc0   :  { %364 = vmatprep.subr.bf16.mxu0 %v2227_v10  ;;  %p2570_p11 = por %p2569_p10, %p2568_p9 }
  0xc1   :  { %2097 = vmatpush3.bf16.msra.mxu1 %v2242_v18 }
  0xc2   :  { %2098 = vmatprep.subr.bf16.mxu1 %v2615_v1  ;;  %p2571_p12 = pnand %p2570_p11, %p2564_p8 }
  0xc3   :  { %365 = vmatpush1.bf16.msra.mxu0 %v2229_v13 }
  0xc4   :  { %366 = vmatprep.subr.bf16.mxu0 %v2230_v14 }
  0xc5   :  { %2099 = vmatpush3.bf16.msra.mxu1 %v2243_v21 }
  0xc6   :  { %2100 = vmatprep.subr.bf16.mxu1 %v2615_v1 }
  0xc7   :  { %367 = vmatpush1.bf16.msra.mxu0 %v2232_v16 }
  0xc8   :  { %368 = vmatprep.subr.bf16.mxu0 %v2233_v17 }
  0xc9   :  { %2101 = vmatpush3.bf16.msra.mxu1 %v2244_v25 }
  0xca   :  { %2102 = vmatprep.subr.bf16.mxu1 %v2615_v1 }
  0xcb   :  { %369 = vmatpush1.bf16.msra.mxu0 %v2235_v19 }
  0xcc   :  { %370 = vmatprep.subr.bf16.mxu0 %v2236_v20 }
  0xcd   :  { %2103 = vmatpush3.bf16.msra.mxu1 %v2245_v27  ;;  %v2248_v27 = vld [vmem:[#allocation8 + $0x8] sm:$0xff]  }
  0xce   :  { %2104 = vmatprep.subr.bf16.mxu1 %v2615_v1 }
  0xcf   :  { %371 = vmatpush1.bf16.msra.mxu0 %v2238_v22 }
  0xd0   :  { %2134 = vmatprep.subr.bf16.mxu0 %v2615_v1 }
  0xd1   :  { %2105 = vmatpush3.bf16.msra.mxu1 %v2246_v28  ;;  %v2249_v28 = vld [vmem:[#allocation8 + $0x10] sm:$0xff]  }
  0xd2   :  { %389 = vmatmul.mubr.bf16.vlgmr.msra.gmra.mrb[0].mxu0 %v178_v26  ;;  %2110 = vmatprep.subr.bf16.mxu1 %v2615_v1 }
  0xd3   :  { %2150 = vmatprep.mubr.msk.bf16.mxu0 %vm2616_vm0, %v2615_v1 }
  0xd4   :  { %2107 = vmatmul.mubr.bf16.vlgmr.msra.gmra.mrb[0].mxu1 %v178_v26  ;;  %v2247_v26 = vld [vmem:[#allocation8] sm:$0xff]  }
  0xd5   :  { %2112 = vmatprep.mubr.msk.bf16.mxu1 %vm2616_vm0, %v2615_v1  ;;  %2135 = vmatpush3.bf16.msra.mxu0 %v2247_v26  ;;  %v2284_v26 = vld [vmem:[#allocation10 + $0x8c] ss:$16 sps:$4 sm:$0xff]  }
  0xd6   :  { %2136 = vmatprep.subr.bf16.mxu0 %v2615_v1 }
  0xd9   :  { %2137 = vmatpush3.bf16.msra.mxu0 %v2248_v27  ;;  %v2279_v27 = vld [vmem:[#allocation10 + $0x80] ss:$16 sps:$4 sm:$0xff]  }
  0xda   :  { %2138 = vmatprep.subr.bf16.mxu0 %v2615_v1 }
  0xdd   :  { %2139 = vmatpush3.bf16.msra.mxu0 %v2249_v28  ;;  %v2282_v28 = vld [vmem:[#allocation10 + $0x88] ss:$16 sps:$4 sm:$0xff]  }
  0xde   :  { %2140 = vmatprep.subr.bf16.mxu0 %v2615_v1 }
  0xe1   :  { %2141 = vmatpush3.bf16.msra.mxu0 %v2250_v29  ;;  %v2287_v29 = vld [vmem:[#allocation10 + $0xa4] ss:$16 sps:$4 sm:$0xff]  }
  0xe2   :  { %2142 = vmatprep.subr.bf16.mxu0 %v2615_v1 }
  0xe5   :  { %2143 = vmatpush3.bf16.msra.mxu0 %v2251_v32  ;;  %v2290_v32 = vld [vmem:[#allocation10 + $0xac] ss:$16 sps:$4 sm:$0xff]  }
  0xe6   :  { %2144 = vmatprep.subr.bf16.mxu0 %v2615_v1 }
 0x1a5   :  { %v390_v35 = vpop.f32.mrb[0].mxu0 }
 0x1a6   :  { %v392_v36 = vpop.f32.mrb[1].mxu0  ;;  %v391_v42 = vadd.f32 %v390_v35, %v216_v39 }
 0x1a7   :  { %v393_v37 = vadd.f32 %v392_v36, %v220_v33  ;;  %v394_v38 = vpop.f32.mrb[2].mxu0  ;;  %v433_v50 = vpop.f32.mrb[0].mxu1 }
 0x1a8   :  { %v396_v40 = vpop.f32.mrb[3].mxu0  ;;  %v440_v44 = vpack.c.bf16 %v391_v42, %v391_v42  ;;  %v395_v46 = vadd.f32 %v394_v38, %v216_v39  ;;  %v434_v51 = vadd.f32 %v433_v50, %v224_v49  ;;  %v2108_v52 = vpop.f32.mrb[1].mxu1  ;;  %v2252_v42 = vld [vmem:[#allocation8 + $0x28] sm:$0xff]  }
 0x1a9   :  { %v442_v41 = vpack.c.bf16 %v393_v37, %v393_v37  ;;  %v397_v43 = vadd.f32 %v396_v40, %v220_v33  ;;  %v436_v53 = vpop.f32.mrb[2].mxu1  ;;  %2145 = vmatpush3.bf16.msra.mxu0 %v2252_v42  ;;  %v2297_v42 = vld [vmem:[#allocation10 + $0xe0] ss:$16 sps:$4 sm:$0xff]  }
 0x1aa   :  { %v441_v47 = vpack.c.bf16 %v395_v46, %v395_v46  ;;  %v567_v54 = vpack.c.bf16 %v434_v51, %v434_v51  ;;  %v437_v55 = vadd.f32 %v436_v53, %v224_v49  ;;  %v2109_v56 = vpop.f32.mrb[3].mxu1  ;;  %2146 = vmatprep.subr.bf16.mxu0 %v2615_v1 }
 0x1ab   :  { %2111 = vmatpush3.bf16.xpose.msra.mxu1 %v442_v41  ;;  %v443_v45 = vpack.c.bf16 %v397_v43, %v397_v43  ;;  %v2253_v43 = vld [vmem:[#allocation8 + $0x30] sm:$0xff]  }
 0x1ac   :  { %2116 = vmatprep.subr.bf16.mxu1 %v2615_v1  ;;  %v574_v57 = vsel %vm572_vm1, %v567_v54, 0  ;;  %v568_v58 = vpack.c.bf16 %v437_v55, %v437_v55  ;;  %v1904_v55 = vld [vmem:[%s3041_s5] ss:$0 sm:$0xff] }
 0x1ad   :  { %2147 = vmatpush3.bf16.msra.mxu0 %v2253_v43  ;;  %v2300_v43 = vld [vmem:[#allocation10 + $0xe8] ss:$16 sps:$4 sm:$0xff]  }
 0x1ae   :  { %v620_v59 = vsel %vm572_vm1, %v568_v58, 0  ;;  %2148 = vmatprep.subr.bf16.mxu0 %v2615_v1 }
 0x1b2   :  { %2113 = vmatmul.mubr.bf16.vlgmr.msra.gmra.mrb[4].mxu1 %v440_v44  ;;  %v2254_v44 = vld [vmem:[#allocation8 + $0x38] sm:$0xff]  }
 0x1b3   :  { %2117 = vmatpush3.bf16.xpose.msra.mxu1 %v443_v45  ;;  %2118 = vmatprep.mubr.msk.bf16.mxu1 %vm2616_vm0, %v2615_v1 }
 0x1b4   :  { %2122 = vmatprep.subr.bf16.mxu1 %v2615_v1  ;;  %2149 = vmatpush3.bf16.msra.mxu0 %v2254_v44 }
 0x1ba   :  { %2119 = vmatmul.mubr.bf16.vlgmr.msra.gmra.mrb[8].mxu1 %v441_v47 }
 0x1bb   :  { %2124 = vmatprep.mubr.msk.bf16.mxu1 %vm2616_vm0, %v2615_v1  ;;  %2123 = vmatpush3.bf16.msra.mxu1 %v574_v57 }
 0x1bc   :  { %2128 = vmatprep.subr.bf16.mxu1 %v2615_v1 }
 0x285   :  { %v478_v60 = vpop.f32.mrb[4].mxu1 }
 0x286   :  { %v524_v62 = vmul.f32 0.088388346, %v478_v60  ;;  %v2114_v63 = vpop.f32.mrb[5].mxu1 }
 0x287   :  { %v481_v2 = vpop.f32.mrb[6].mxu1 }
 0x288   :  { %v2115_v3 = vpop.f32.mrb[7].mxu1  ;;  %v540_v4 = vadd.f32 %v1900_v61, %v524_v62  ;;  %v2255_v2 = vld [vmem:[#allocation10] ss:$16 sps:$4 sm:$0xff]  }
 0x289   :  { %v2257_v3 = vld [vmem:[#allocation10 + $0x4] ss:$16 sps:$4 sm:$0xff]  }
 0x28a   :  { %v543_v5 = vsel %vm542_vm2, %v540_v4, -inf }
 0x28b   :  { %544 = vmax.xlane.f32.xlu0 %v543_v5  ;;  %v2263_v5 = vld [vmem:[#allocation10 + $0x24] ss:$16 sps:$4 sm:$0xff]  }
 0x28d   :  { %v518_v6 = vpop.f32.mrb[8].mxu1 }
 0x28e   :  { %v525_v8 = vmul.f32 0.088388346, %v518_v6  ;;  %v2120_v9 = vpop.f32.mrb[9].mxu1  ;;  %v2266_v6 = vld [vmem:[#allocation10 + $0x2c] ss:$16 sps:$4 sm:$0xff]  }
 0x28f   :  { %v521_v10 = vpop.f32.mrb[10].mxu1 }
 0x290   :  { %v2121_v11 = vpop.f32.mrb[11].mxu1  ;;  %v541_v12 = vadd.f32 %v1901_v7, %v525_v8  ;;  %v2261_v7 = vld [vmem:[#allocation10 + $0x20] ss:$16 sps:$4 sm:$0xff]   ;;  %v2264_v8 = vld [vmem:[#allocation10 + $0x28] ss:$16 sps:$4 sm:$0xff]  }
 0x292   :  { %v546_v13 = vsel %vm542_vm2, %v541_v12, -inf }
 0x293   :  { %547 = vmax.xlane.f32.xlu0 %v546_v13 }
 0x318   :  { %v545_v14 = vpop.xlane.xlu0 %544 }
 0x319   :  { %v549_v15 = vsub.f32 %v540_v4, %v545_v14  ;;  %v2258_v4 = vld [vmem:[#allocation10 + $0x8] ss:$16 sps:$4 sm:$0xff]  }
 0x31b   :  { %v551_v16 = vmul.f32 1.442695, %v549_v15  ;;  %v2269_v15 = vld [vmem:[#allocation10 + $0x44] ss:$16 sps:$4 sm:$0xff]  }
 0x31d   :  { %2351 = vpow2.f32 %v551_v16  ;;  %v2272_v16 = vld [vmem:[#allocation10 + $0x4c] ss:$16 sps:$4 sm:$0xff]  }
 0x320   :  { %v548_v17 = vpop.xlane.xlu0 %547 }
 0x321   :  { %v550_v18 = vsub.f32 %v541_v12, %v548_v17  ;;  %v2267_v17 = vld [vmem:[#allocation10 + $0x40] ss:$16 sps:$4 sm:$0xff]  }
 0x323   :  { %v553_v19 = vmul.f32 1.442695, %v550_v18  ;;  %v2270_v18 = vld [vmem:[#allocation10 + $0x48] ss:$16 sps:$4 sm:$0xff]  }
 0x325   :  { %2353 = vpow2.f32 %v553_v19  ;;  %v2275_v19 = vld [vmem:[#allocation10 + $0x64] ss:$16 sps:$4 sm:$0xff]  }
 0x327   :  { %v2352_v20 = vpop.eup %2351 }
 0x328   :  { %v555_v21 = vsel %vm542_vm2, %v2352_v20, 0.0 }
 0x329   :  { %556 = vadd.xlane.f32.xlu1 %v555_v21  ;;  %v2273_v21 = vld [vmem:[#allocation10 + $0x60] ss:$16 sps:$4 sm:$0xff]  }
 0x32f   :  { %v2354_v22 = vpop.eup %2353 }
 0x330   :  { %v558_v25 = vsel %vm542_vm2, %v2354_v22, 0.0 }
 0x331   :  { %559 = vadd.xlane.f32.xlu1 %v558_v25  ;;  %v2281_v25 = vld [vmem:[#allocation10 + $0x84] ss:$16 sps:$4 sm:$0xff]  }
 0x3b6   :  { %v557_v33 = vpop.xlane.xlu1 %556 }
 0x3b7   :  { %2355 = vrcp.f32 %v557_v33  ;;  %v2285_v33 = vld [vmem:[#allocation10 + $0xa0] ss:$16 sps:$4 sm:$0xff]  }
 0x3be   :  { %v560_v35 = vpop.xlane.xlu1 %559 }
 0x3bf   :  { %2357 = vrcp.f32 %v560_v35  ;;  %v2288_v35 = vld [vmem:[#allocation10 + $0xa8] ss:$16 sps:$4 sm:$0xff]  }
 0x3c1   :  { %v2356_v36 = vpop.eup %2355 }
 0x3c2   :  { %v563_v37 = vmul.f32 %v2356_v36, %v2352_v20  ;;  %v2278_v20 = vld [vmem:[#allocation10 + $0x6c] ss:$16 sps:$4 sm:$0xff]   ;;  %v2293_v36 = vld [vmem:[#allocation10 + $0xc4] ss:$16 sps:$4 sm:$0xff]  }
 0x3c4   :  { %v565_v38 = vpack.c.bf16 %v563_v37, %v563_v37  ;;  %v2296_v37 = vld [vmem:[#allocation10 + $0xcc] ss:$16 sps:$4 sm:$0xff]  }
 0x3c6   :  { %2125 = vmatmul.mubr.msk.bf16.vlgmr.msra.gmra.mrb[12].mxu1 %vm542_vm2, %v565_v38  ;;  %v2291_v38 = vld [vmem:[#allocation10 + $0xc0] ss:$16 sps:$4 sm:$0xff]  }
 0x3c7   :  { %2129 = vmatpush3.bf16.msra.mxu1 %v620_v59  ;;  %2130 = vmatprep.mubr.msk.bf16.mxu1 %vm2616_vm0, %v2615_v1 }
 0x3c8   :  { %1033 = vmatprep.subr.bf16.mxu1 %v2257_v3  ;;  %v2306_v3 = vld [vmem:[#allocation11 + $0x80] sm:$0xff]  }
 0x3c9   :  { %v2358_v39 = vpop.eup %2357 }
 0x3ca   :  { %v564_v40 = vmul.f32 %v2358_v39, %v2354_v22  ;;  %v2276_v22 = vld [vmem:[#allocation10 + $0x68] ss:$16 sps:$4 sm:$0xff]  }
 0x3cb   :  { %v2294_v39 = vld [vmem:[#allocation10 + $0xc8] ss:$16 sps:$4 sm:$0xff]  }
 0x3cc   :  { %v566_v41 = vpack.c.bf16 %v564_v40, %v564_v40  ;;  %v2299_v40 = vld [vmem:[#allocation10 + $0xe4] ss:$16 sps:$4 sm:$0xff]  }
 0x3ce   :  { %2131 = vmatmul.mubr.msk.bf16.vlgmr.msra.gmra.mrb[16].mxu1 %vm542_vm2, %v566_v41  ;;  %v2302_v41 = vld [vmem:[#allocation10 + $0xec] ss:$16 sps:$4 sm:$0xff]  }
 0x3cf   :  { %1065 = vmatprep.mubr.bf16.mxu1 %v2614_v0  ;;  %1034 = vmatpush1.bf16.msra.mxu1 %v2255_v2  ;;  %v2305_v2 = vld [vmem:[#allocation11] sm:$0xff]  }
 0x3d0   :  { %1035 = vmatprep.subr.bf16.mxu1 %v2263_v5  ;;  %v2309_v5 = vld [vmem:[#allocation11 + $0x8] sm:$0xff]  }
 0x3d3   :  { %1036 = vmatpush1.bf16.msra.mxu1 %v2261_v7  ;;  %v2311_v7 = vld [vmem:[#allocation11 + $0x50] sm:$0xff]  }
 0x3d4   :  { %1037 = vmatprep.subr.bf16.mxu1 %v2269_v15  ;;  %v2321_v15 = vld [vmem:[#allocation11 + $0x20] sm:$0xff]  }
 0x3d7   :  { %1038 = vmatpush1.bf16.msra.mxu1 %v2267_v17  ;;  %v2323_v17 = vld [vmem:[#allocation11 + $0x68] sm:$0xff]  }
 0x3d8   :  { %1039 = vmatprep.subr.bf16.mxu1 %v2275_v19  ;;  %v2325_v19 = vld [vmem:[#allocation11 + $0x28] sm:$0xff]  }
 0x3db   :  { %1040 = vmatpush1.bf16.msra.mxu1 %v2273_v21  ;;  %v2327_v21 = vld [vmem:[#allocation11 + $0x70] sm:$0xff]  }
 0x3dc   :  { %1041 = vmatprep.subr.bf16.mxu1 %v2281_v25  ;;  %v2329_v25 = vld [vmem:[#allocation11 + $0x30] sm:$0xff]  }
 0x3df   :  { %1042 = vmatpush1.bf16.msra.mxu1 %v2279_v27  ;;  %v2331_v27 = vld [vmem:[#allocation11 + $0x78] sm:$0xff]  }
 0x3e0   :  { %1043 = vmatprep.subr.bf16.mxu1 %v2287_v29  ;;  %v2333_v29 = vld [vmem:[#allocation11 + $0x38] sm:$0xff]  }
 0x3e3   :  { %1044 = vmatpush1.bf16.msra.mxu1 %v2285_v33  ;;  %v851_v33 = vld [vmem:[%s3045_s9] sm:$0xf] }
 0x3e4   :  { %1045 = vmatprep.subr.bf16.mxu1 %v2293_v36  ;;  %v856_v36 = vrot.slane %v851_v33, %v215_v34 }
 0x3e7   :  { %1046 = vmatpush1.bf16.msra.mxu1 %v2291_v38  ;;  %v860_v38 = vrot.slane %v851_v33, %v219_v31 }
 0x3e8   :  { %1047 = vmatprep.subr.bf16.mxu1 %v2299_v40 }
 0x3eb   :  { %1048 = vmatpush1.bf16.msra.mxu1 %v2297_v42 }
 0x499   :  { %v610_v45 = vpop.f32.mrb[12].mxu1 }
 0x49a   :  { %v2126_v46 = vpop.f32.mrb[13].mxu1 }
 0x49b   :  { %v613_v47 = vpop.f32.mrb[14].mxu1 }
 0x49c   :  { %v2127_v49 = vpop.f32.mrb[15].mxu1 }
 0x4a1   :  { %v656_v50 = vpop.f32.mrb[16].mxu1 }
 0x4a2   :  { %v662_v51 = vpack.c.bf16 %v656_v50, %v610_v45  ;;  %v2132_v52 = vpop.f32.mrb[17].mxu1 }
 0x4a3   :  { %v659_v53 = vpop.f32.mrb[18].mxu1  ;;  %v1913_v52 = vld [vmem:[%s3042_s6] ss:$0 sm:$0xff] }
 0x4a4   :  { %v2133_v54 = vpop.f32.mrb[19].mxu1  ;;  %2151 = vmatmul.mubr.bf16.vlgmr.msra.gmra.mrb[4].mxu0 %v662_v51 }
 0x4a5   :  { %1108 = vmatprep.mubr.bf16.mxu0 %v2614_v0  ;;  %v2260_v0 = vld [vmem:[#allocation10 + $0xc] ss:$16 sps:$4 sm:$0xff]  }
 0x4a6   :  { %1076 = vmatprep.subr.bf16.mxu0 %v2260_v0  ;;  %v2308_v0 = vld [vmem:[#allocation11 + $0xc8] sm:$0xff]  }
 0x4a7   :  { %1077 = vmatpush1.bf16.msra.mxu0 %v2258_v4  ;;  %v2307_v4 = vld [vmem:[#allocation11 + $0x48] sm:$0xff]  }
 0x4a8   :  { %1078 = vmatprep.subr.bf16.mxu0 %v2266_v6  ;;  %v2310_v6 = vld [vmem:[#allocation11 + $0x88] sm:$0xff]  }
 0x4ab   :  { %1079 = vmatpush1.bf16.msra.mxu0 %v2264_v8  ;;  %v2312_v8 = vld [vmem:[#allocation11 + $0xd0] sm:$0xff]  }
 0x4ac   :  { %1080 = vmatprep.subr.bf16.mxu0 %v2272_v16  ;;  %v2322_v16 = vld [vmem:[#allocation11 + $0xa0] sm:$0xff]  }
 0x4af   :  { %1081 = vmatpush1.bf16.msra.mxu0 %v2270_v18  ;;  %v2324_v18 = vld [vmem:[#allocation11 + $0xe8] sm:$0xff]  }
 0x4b0   :  { %1082 = vmatprep.subr.bf16.mxu0 %v2278_v20  ;;  %v2326_v20 = vld [vmem:[#allocation11 + $0xa8] sm:$0xff]  }
 0x4b3   :  { %1083 = vmatpush1.bf16.msra.mxu0 %v2276_v22  ;;  %v2328_v22 = vld [vmem:[#allocation11 + $0xf0] sm:$0xff]  }
 0x4b4   :  { %1084 = vmatprep.subr.bf16.mxu0 %v2284_v26  ;;  %v2330_v26 = vld [vmem:[#allocation11 + $0xb0] sm:$0xff]  }
 0x4b7   :  { %1085 = vmatpush1.bf16.msra.mxu0 %v2282_v28  ;;  %v2332_v28 = vld [vmem:[#allocation11 + $0xf8] sm:$0xff]  }
 0x4b8   :  { %1086 = vmatprep.subr.bf16.mxu0 %v2290_v32  ;;  %v2334_v32 = vld [vmem:[#allocation11 + $0xb8] sm:$0xff]  }
 0x4bb   :  { %1087 = vmatpush1.bf16.msra.mxu0 %v2288_v35  ;;  %v867_v35 = vsub.s32 3, %v2864_v30 }
 0x4bc   :  { %1088 = vmatprep.subr.bf16.mxu0 %v2296_v37  ;;  %v864_v37 = vrot.slane %v851_v33, %v223_v48 }
 0x4bf   :  { %1089 = vmatpush1.bf16.msra.mxu0 %v2294_v39  ;;  %v868_v39 = vrot.slane %v851_v33, %v867_v35 }
 0x4c0   :  { %1090 = vmatprep.subr.bf16.mxu0 %v2302_v41 }
 0x4c3   :  { %1091 = vmatpush1.bf16.msra.mxu0 %v2300_v43 }
 0x577   :  { %v768_v56 = vpop.f32.mrb[4].mxu0 }
 0x578   :  { %v769_v57 = vadd.f32 %v1904_v55, %v768_v56  ;;  %v2152_v58 = vpop.f32.mrb[5].mxu0 }
 0x579   :  { %v771_v59 = vpop.f32.mrb[6].mxu0 }
 0x57a   :  { %v772_v60 = vadd.f32 %v1904_v55, %v771_v59  ;;  %v2153_v61 = vpop.f32.mrb[7].mxu0  ;;  %v775_v62 = vadd.f32 %v769_v57, %v2846_v23  ;;  %v1914_v57 = vld [vmem:[%s3043_s7] ss:$0 sm:$0xff] }
 0x57c   :  { %779 = vadd.xlane.f32.xlu0 %v775_v62  ;;  %v776_v63 = vadd.f32 %v772_v60, %v2848_v24 }
 0x57e   :  { %781 = vadd.xlane.f32.xlu1 %v776_v63 }
 0x609   :  { %v780_v23 = vpop.xlane.xlu0 %779 }
 0x60a   :  { %v784_v9 = vmul.f32 0.0078125, %v780_v23  ;;  %v2313_v23 = vld [vmem:[#allocation11 + $0x10] sm:$0xff]  }
 0x60b   :  { %v782_v24 = vpop.xlane.xlu1 %781 }
 0x60c   :  { %v2907_v10 = vsub.f32 %v775_v62, %v784_v9  ;;  %v785_v11 = vmul.f32 0.0078125, %v782_v24  ;;  %v2303_v62 = vld [vmem:[#allocation11 + $0x40] sm:$0xff]   ;;  %v2314_v9 = vld [vmem:[#allocation11 + $0x90] sm:$0xff]   ;;  %v2315_v24 = vld [vmem:[#allocation11 + $0x58] sm:$0xff]  }
 0x60d   :  { %2028 = vmatprep.subr.bf16.mxu1 %v2303_v62 }
 0x60e   :  { %v2909_v12 = vsub.f32 %v776_v63, %v785_v11  ;;  %v788_v13 = vmul.f32 %v2907_v10, %v2907_v10  ;;  %v2304_v63 = vld [vmem:[#allocation11 + $0xc0] sm:$0xff]   ;;  %v2317_v11 = vld [vmem:[#allocation11 + $0x18] sm:$0xff]  }
 0x60f   :  { %2050 = vmatprep.subr.bf16.mxu0 %v2304_v63 }
 0x610   :  { %790 = vadd.xlane.f32.xlu0 %v788_v13  ;;  %v789_v14 = vmul.f32 %v2909_v12, %v2909_v12  ;;  %v2319_v13 = vld [vmem:[#allocation11 + $0x60] sm:$0xff]  }
 0x612   :  { %792 = vadd.xlane.f32.xlu1 %v789_v14  ;;  %v2320_v14 = vld [vmem:[#allocation11 + $0xe0] sm:$0xff]  }
 0x69d   :  { %v791_v44 = vpop.xlane.xlu0 %790 }
 0x69e   :  { %v794_v45 = vmul.f32 0.0078125, %v791_v44 }
 0x69f   :  { %v793_v46 = vpop.xlane.xlu1 %792 }
 0x6a0   :  { %v796_v47 = vadd.f32 1e-05, %v794_v45  ;;  %v795_v49 = vmul.f32 0.0078125, %v793_v46 }
 0x6a2   :  { %2359 = vrsqrt.f32 %v796_v47  ;;  %v797_v50 = vadd.f32 1e-05, %v795_v49 }
 0x6a4   :  { %2361 = vrsqrt.f32 %v797_v50 }
 0x6ac   :  { %v2360_v51 = vpop.eup %2359 }
 0x6ad   :  { %v800_v53 = vmul.f32 %v2360_v51, %v2907_v10  ;;  %v2316_v10 = vld [vmem:[#allocation11 + $0xd8] sm:$0xff]  }
 0x6ae   :  { %v2362_v54 = vpop.eup %2361 }
 0x6af   :  { %v801_v55 = vmul.f32 %v2362_v54, %v2909_v12  ;;  %v808_v56 = vmul.f32 %v1913_v52, %v800_v53  ;;  %v2318_v12 = vld [vmem:[#allocation11 + $0x98] sm:$0xff]  }
 0x6b1   :  { %v809_v58 = vmul.f32 %v1913_v52, %v801_v55  ;;  %v2923_v59 = vadd.f32 %v1914_v57, %v808_v56 }
 0x6b3   :  { %v2925_v60 = vadd.f32 %v1914_v57, %v809_v58 }
 0x6b5   :  { %v818_v61 = vpack.c.bf16 %v2925_v60, %v2923_v59 }
 0x6b7   :  { %1066 = vmatmul.mubr.bf16.vlgmr.msra.gmra.mrb[20].mxu1 %v818_v61  ;;  %1109 = vmatmul.mubr.bf16.vlgmr.msra.gmra.mrb[8].mxu0 %v818_v61 }
 0x6b8   :  { %2029 = vmatpush3.bf16.msra.mxu1 %v2305_v2  ;;  %2051 = vmatpush3.bf16.msra.mxu0 %v2306_v3 }
 0x6b9   :  { %2030 = vmatprep.subr.bf16.mxu1 %v2307_v4  ;;  %2052 = vmatprep.subr.bf16.mxu0 %v2308_v0 }
 0x6bc   :  { %2031 = vmatpush3.bf16.msra.mxu1 %v2309_v5  ;;  %2053 = vmatpush3.bf16.msra.mxu0 %v2310_v6 }
 0x6bd   :  { %2032 = vmatprep.subr.bf16.mxu1 %v2311_v7  ;;  %2054 = vmatprep.subr.bf16.mxu0 %v2312_v8 }
 0x6c0   :  { %2033 = vmatpush3.bf16.msra.mxu1 %v2313_v23  ;;  %2055 = vmatpush3.bf16.msra.mxu0 %v2314_v9 }
 0x6c1   :  { %2034 = vmatprep.subr.bf16.mxu1 %v2315_v24  ;;  %2056 = vmatprep.subr.bf16.mxu0 %v2316_v10 }
 0x6c4   :  { %2035 = vmatpush3.bf16.msra.mxu1 %v2317_v11  ;;  %2057 = vmatpush3.bf16.msra.mxu0 %v2318_v12 }
 0x6c5   :  { %2036 = vmatprep.subr.bf16.mxu1 %v2319_v13  ;;  %2058 = vmatprep.subr.bf16.mxu0 %v2320_v14 }
 0x6c8   :  { %2037 = vmatpush3.bf16.msra.mxu1 %v2321_v15  ;;  %2059 = vmatpush3.bf16.msra.mxu0 %v2322_v16 }
 0x6c9   :  { %2038 = vmatprep.subr.bf16.mxu1 %v2323_v17  ;;  %2060 = vmatprep.subr.bf16.mxu0 %v2324_v18 }
 0x6cc   :  { %2039 = vmatpush3.bf16.msra.mxu1 %v2325_v19  ;;  %2061 = vmatpush3.bf16.msra.mxu0 %v2326_v20 }
 0x6cd   :  { %2040 = vmatprep.subr.bf16.mxu1 %v2327_v21  ;;  %2062 = vmatprep.subr.bf16.mxu0 %v2328_v22 }
 0x6d0   :  { %2041 = vmatpush3.bf16.msra.mxu1 %v2329_v25  ;;  %2063 = vmatpush3.bf16.msra.mxu0 %v2330_v26 }
 0x6d1   :  { %2042 = vmatprep.subr.bf16.mxu1 %v2331_v27  ;;  %2064 = vmatprep.subr.bf16.mxu0 %v2332_v28 }
 0x6d4   :  { %2043 = vmatpush3.bf16.msra.mxu1 %v2333_v29  ;;  %2065 = vmatpush3.bf16.msra.mxu0 %v2334_v32 }
 0x6d5   :  { %2154 = vmatprep.subr.bf16.mxu1 %v2615_v1  ;;  %2174 = vmatprep.subr.bf16.mxu0 %v2615_v1 }
 0x78a   :  { %v1067_v40 = vpop.f32.mrb[20].mxu1  ;;  %v1110_v41 = vpop.f32.mrb[8].mxu0 }
 0x78b   :  { %v2941_v42 = vadd.f32 %v1067_v40, %v856_v36  ;;  %v2943_v43 = vadd.f32 %v1110_v41, %v864_v37  ;;  %v1069_v44 = vpop.f32.mrb[21].mxu1  ;;  %v1112_v45 = vpop.f32.mrb[9].mxu0 }
 0x78c   :  { %v2945_v46 = vadd.f32 %v1069_v44, %v860_v38  ;;  %v2947_v47 = vadd.f32 %v1112_v45, %v868_v39  ;;  %v1071_v34 = vpop.f32.mrb[22].mxu1  ;;  %v1114_v49 = vpop.f32.mrb[10].mxu0 }
 0x78d   :  { %v1127_v48 = vmul.f32 0.044715, %v2941_v42  ;;  %v1129_v30 = vmul.f32 0.044715, %v2943_v43  ;;  %v1072_v31 = vadd.f32 %v1071_v34, %v856_v36  ;;  %v1115_v50 = vadd.f32 %v1114_v49, %v864_v37  ;;  %v1073_v51 = vpop.f32.mrb[23].mxu1  ;;  %v1116_v52 = vpop.f32.mrb[11].mxu0 }
 0x78e   :  { %v1128_v53 = vmul.f32 0.044715, %v2945_v46  ;;  %v1130_v54 = vmul.f32 0.044715, %v2947_v47  ;;  %v2953_v55 = vadd.f32 %v1073_v51, %v860_v38  ;;  %v2955_v56 = vadd.f32 %v1116_v52, %v868_v39 }
 0x78f   :  { %v1135_v57 = vmul.f32 %v1127_v48, %v2941_v42  ;;  %v1137_v58 = vmul.f32 %v1129_v30, %v2943_v43  ;;  %v1131_v61 = vmul.f32 0.044715, %v1072_v31  ;;  %v1133_v62 = vmul.f32 0.044715, %v1115_v50 }
 0x790   :  { %v1136_v63 = vmul.f32 %v1128_v53, %v2945_v46  ;;  %v1138_v2 = vmul.f32 %v1130_v54, %v2947_v47  ;;  %v1132_v3 = vmul.f32 0.044715, %v2953_v55  ;;  %v1134_v4 = vmul.f32 0.044715, %v2955_v56 }
 0x791   :  { %v1143_v0 = vmul.f32 %v1135_v57, %v2941_v42  ;;  %v1145_v5 = vmul.f32 %v1137_v58, %v2943_v43  ;;  %v1139_v6 = vmul.f32 %v1131_v61, %v1072_v31  ;;  %v1141_v7 = vmul.f32 %v1133_v62, %v1115_v50 }
 0x792   :  { %v1144_v8 = vmul.f32 %v1136_v63, %v2945_v46  ;;  %v1146_v23 = vmul.f32 %v1138_v2, %v2947_v47  ;;  %v1140_v9 = vmul.f32 %v1132_v3, %v2953_v55  ;;  %v1142_v24 = vmul.f32 %v1134_v4, %v2955_v56 }
 0x793   :  { %v1151_v10 = vadd.f32 %v1143_v0, %v2941_v42  ;;  %v1153_v11 = vadd.f32 %v1145_v5, %v2943_v43  ;;  %v1147_v12 = vmul.f32 %v1139_v6, %v1072_v31  ;;  %v1149_v13 = vmul.f32 %v1141_v7, %v1115_v50 }
 0x794   :  { %v1148_v14 = vmul.f32 %v1140_v9, %v2953_v55  ;;  %v1150_v15 = vmul.f32 %v1142_v24, %v2955_v56  ;;  %v1152_v20 = vadd.f32 %v1144_v8, %v2945_v46  ;;  %v1154_v26 = vadd.f32 %v1146_v23, %v2947_v47 }
 0x795   :  { %v1159_v16 = vmul.f32 0.7978846, %v1151_v10  ;;  %v1161_v17 = vmul.f32 0.7978846, %v1153_v11  ;;  %v1155_v18 = vadd.f32 %v1147_v12, %v1072_v31  ;;  %v1157_v19 = vadd.f32 %v1149_v13, %v1115_v50 }
 0x796   :  { %v1156_v21 = vadd.f32 %v1148_v14, %v2953_v55  ;;  %v1160_v27 = vmul.f32 0.7978846, %v1152_v20  ;;  %v1158_v29 = vadd.f32 %v1150_v15, %v2955_v56  ;;  %v1162_v32 = vmul.f32 0.7978846, %v1154_v26 }
 0x797   :  { %2363 = vtanh.f32 %v1159_v16  ;;  %v1163_v22 = vmul.f32 0.7978846, %v1155_v18  ;;  %v1165_v25 = vmul.f32 0.7978846, %v1157_v19  ;;  %v1119_v41 = vmul.f32 0.5, %v2941_v42 }
 0x798   :  { %2365 = vtanh.f32 %v1161_v17  ;;  %v1164_v28 = vmul.f32 0.7978846, %v1156_v21  ;;  %v1166_v33 = vmul.f32 0.7978846, %v1158_v29  ;;  %v1123_v44 = vmul.f32 0.5, %v1072_v31 }
 0x799   :  { %2367 = vtanh.f32 %v1163_v22  ;;  %v1121_v49 = vmul.f32 0.5, %v2943_v43  ;;  %v1125_v48 = vmul.f32 0.5, %v1115_v50  ;;  %v1120_v52 = vmul.f32 0.5, %v2945_v46 }
 0x79a   :  { %2369 = vtanh.f32 %v1165_v25  ;;  %v1124_v61 = vmul.f32 0.5, %v2953_v55  ;;  %v1122_v31 = vmul.f32 0.5, %v2947_v47  ;;  %v1126_v3 = vmul.f32 0.5, %v2955_v56  ;;  %v1947_v55 = vld [vmem:[%s3047_s11] ss:$0 sm:$0xff] }
 0x79b   :  { %2371 = vtanh.f32 %v1160_v27 }
 0x79c   :  { %2373 = vtanh.f32 %v1164_v28 }
 0x79d   :  { %2375 = vtanh.f32 %v1162_v32 }
 0x79e   :  { %2377 = vtanh.f32 %v1166_v33 }
 0x7a1   :  { %v2364_v35 = vpop.eup %2363 }
 0x7a2   :  { %v2366_v36 = vpop.eup %2365  ;;  %v1175_v37 = vadd.f32 1.0, %v2364_v35 }
 0x7a3   :  { %v2368_v38 = vpop.eup %2367  ;;  %v1177_v39 = vadd.f32 1.0, %v2366_v36 }
 0x7a4   :  { %v2370_v40 = vpop.eup %2369  ;;  %v1179_v45 = vadd.f32 1.0, %v2368_v38  ;;  %v1183_v54 = vmul.f32 %v1175_v37, %v1119_v41  ;;  %v2335_v37 = vld [vmem:[#allocation13] sm:$0xff]   ;;  %v2336_v38 = vld [vmem:[#allocation13 + $0x8] sm:$0xff]   ;;  %v2341_v41 = vld [vmem:[#allocation13 + $0x30] sm:$0xff]  }
 0x7a5   :  { %v2372_v34 = vpop.eup %2371  ;;  %v1181_v30 = vadd.f32 1.0, %v2370_v40  ;;  %v1185_v63 = vmul.f32 %v1177_v39, %v1121_v49  ;;  %v2339_v39 = vld [vmem:[#allocation13 + $0x20] sm:$0xff]   ;;  %v2340_v40 = vld [vmem:[#allocation13 + $0x28] sm:$0xff]  }
 0x7a6   :  { %v2374_v51 = vpop.eup %2373  ;;  %v1176_v53 = vadd.f32 1.0, %v2372_v34  ;;  %v1187_v57 = vmul.f32 %v1179_v45, %v1123_v44  ;;  %v2343_v44 = vld [vmem:[#allocation14] sm:$0xff]   ;;  %v2342_v45 = vld [vmem:[#allocation13 + $0x38] sm:$0xff]  }
 0x7a7   :  { %v2376_v58 = vpop.eup %2375  ;;  %v1180_v62 = vadd.f32 1.0, %v2374_v51  ;;  %v1189_v2 = vmul.f32 %v1181_v30, %v1125_v48 }
 0x7a8   :  { %v2378_v42 = vpop.eup %2377  ;;  %v1178_v43 = vadd.f32 1.0, %v2376_v58  ;;  %v1191_v50 = vpack.c.bf16 %v1187_v57, %v1183_v54  ;;  %v1184_v4 = vmul.f32 %v1176_v53, %v1120_v52  ;;  %v1980_v54 = vld [vmem:[%s3048_s12] ss:$0 sm:$0xff] }
 0x7a9   :  { %v1188_v0 = vmul.f32 %v1180_v62, %v1124_v61  ;;  %v1182_v5 = vadd.f32 1.0, %v2378_v42  ;;  %v1193_v46 = vpack.c.bf16 %v1189_v2, %v1185_v63  ;;  %v1981_v61 = vld [vmem:[%s3049_s13] ss:$0 sm:$0xff] }
 0x7aa   :  { %v1186_v7 = vmul.f32 %v1178_v43, %v1122_v31 }
 0x7ab   :  { %v1192_v6 = vpack.c.bf16 %v1188_v0, %v1184_v4  ;;  %v1190_v8 = vmul.f32 %v1182_v5, %v1126_v3 }
 0x7ad   :  { %1490 = vmatprep.mubr.bf16.mxu1 %v1192_v6  ;;  %v1194_v23 = vpack.c.bf16 %v1190_v8, %v1186_v7  ;;  %v2344_v6 = vld [vmem:[#allocation14 + $0x8] sm:$0xff]   ;;  %v2345_v7 = vld [vmem:[#allocation14 + $0x10] sm:$0xff]   ;;  %v2346_v8 = vld [vmem:[#allocation14 + $0x18] sm:$0xff]  }
 0x7ae   :  { %1491 = vmatmul.mubr.bf16.vlgmr.msra.gmra.mrb[24].mxu1 %v1191_v50 }
 0x7af   :  { %1531 = vmatprep.mubr.bf16.mxu0 %v1194_v23  ;;  %2170 = vmatprep.mubr.msk.bf16.mxu1 %vm2616_vm0, %v2615_v1  ;;  %v2347_v23 = vld [vmem:[#allocation14 + $0x20] sm:$0xff]  }
 0x7b0   :  { %1532 = vmatmul.mubr.bf16.vlgmr.msra.gmra.mrb[12].mxu0 %v1193_v46  ;;  %2155 = vmatpush3.bf16.msra.mxu1 %v2335_v37 }
 0x7b1   :  { %2190 = vmatprep.mubr.msk.bf16.mxu0 %vm2616_vm0, %v2615_v1  ;;  %2156 = vmatprep.subr.bf16.mxu1 %v2615_v1 }
 0x7b2   :  { %2175 = vmatpush3.bf16.msra.mxu0 %v2343_v44 }
 0x7b3   :  { %2176 = vmatprep.subr.bf16.mxu0 %v2615_v1 }
 0x7b4   :  { %2157 = vmatpush3.bf16.msra.mxu1 %v2336_v38 }
 0x7b5   :  { %2158 = vmatprep.subr.bf16.mxu1 %v2615_v1 }
 0x7b6   :  { %2177 = vmatpush3.bf16.msra.mxu0 %v2344_v6 }
 0x7b7   :  { %2178 = vmatprep.subr.bf16.mxu0 %v2615_v1 }
 0x7ba   :  { %2179 = vmatpush3.bf16.msra.mxu0 %v2345_v7 }
 0x7bb   :  { %2180 = vmatprep.subr.bf16.mxu0 %v2615_v1 }
 0x7be   :  { %2181 = vmatpush3.bf16.msra.mxu0 %v2346_v8 }
 0x7bf   :  { %2182 = vmatprep.subr.bf16.mxu0 %v2615_v1 }
 0x7c2   :  { %2183 = vmatpush3.bf16.msra.mxu0 %v2347_v23 }
 0x7c3   :  { %2184 = vmatprep.subr.bf16.mxu0 %v2615_v1 }
 0x881   :  { %v2044_v47 = vpop.f32.mrb[24].mxu1 }
 0x882   :  { %v2045_v56 = vpop.f32.mrb[25].mxu1 }
 0x883   :  { %v2066_v9 = vpop.f32.mrb[12].mxu0  ;;  %v2046_v24 = vadd.f32 %v2045_v56, %v2044_v47  ;;  %v2047_v10 = vpop.f32.mrb[26].mxu1  ;;  %v2348_v47 = vld [vmem:[#allocation14 + $0x28] sm:$0xff]   ;;  %v2350_v56 = vld [vmem:[#allocation14 + $0x38] sm:$0xff]  }
 0x884   :  { %v2067_v11 = vpop.f32.mrb[13].mxu0  ;;  %v2048_v12 = vpop.f32.mrb[27].mxu1  ;;  %2185 = vmatpush3.bf16.msra.mxu0 %v2348_v47 }
 0x885   :  { %v1493_v13 = vadd.f32 %v2046_v24, %v1947_v55  ;;  %v2068_v14 = vadd.f32 %v2067_v11, %v2066_v9  ;;  %v2069_v15 = vpop.f32.mrb[14].mxu0  ;;  %v2049_v16 = vadd.f32 %v2048_v12, %v2047_v10  ;;  %2186 = vmatprep.subr.bf16.mxu0 %v2615_v1  ;;  %v1982_v9 = vld [vmem:[%s3051_s15] ss:$0 sm:$0xff] }
 0x886   :  { %v2070_v17 = vpop.f32.mrb[15].mxu0 }
 0x887   :  { %v1534_v18 = vadd.f32 %v2068_v14, %v1493_v13  ;;  %v1496_v19 = vadd.f32 %v2049_v16, %v1947_v55  ;;  %v2071_v20 = vadd.f32 %v2070_v17, %v2069_v15  ;;  %v2349_v55 = vld [vmem:[#allocation14 + $0x30] sm:$0xff]  }
 0x888   :  { %2187 = vmatpush3.bf16.msra.mxu0 %v2349_v55 }
 0x889   :  { %v1537_v21 = vadd.f32 %v2071_v20, %v1496_v19  ;;  %v1540_v22 = vadd.f32 %v1534_v18, %v2923_v59  ;;  %v2337_v59 = vld [vmem:[#allocation13 + $0x10] sm:$0xff]   ;;  %2188 = vmatprep.subr.bf16.mxu0 %v2615_v1 }
 0x88a   :  { %2159 = vmatpush3.bf16.msra.mxu1 %v2337_v59 }
 0x88b   :  { %1544 = vadd.xlane.f32.xlu1 %v1540_v22  ;;  %v1541_v25 = vadd.f32 %v1537_v21, %v2925_v60  ;;  %v2338_v60 = vld [vmem:[#allocation13 + $0x18] sm:$0xff]   ;;  %2160 = vmatprep.subr.bf16.mxu1 %v2615_v1 }
 0x88c   :  { %2189 = vmatpush3.bf16.msra.mxu0 %v2350_v56 }
 0x88d   :  { %1546 = vadd.xlane.f32.xlu0 %v1541_v25 }
 0x88e   :  { %2161 = vmatpush3.bf16.msra.mxu1 %v2338_v60 }
 0x88f   :  { %2162 = vmatprep.subr.bf16.mxu1 %v2615_v1 }
 0x892   :  { %2163 = vmatpush3.bf16.msra.mxu1 %v2339_v39 }
 0x893   :  { %2164 = vmatprep.subr.bf16.mxu1 %v2615_v1 }
 0x896   :  { %2165 = vmatpush3.bf16.msra.mxu1 %v2340_v40 }
 0x897   :  { %2166 = vmatprep.subr.bf16.mxu1 %v2615_v1 }
 0x89a   :  { %2167 = vmatpush3.bf16.msra.mxu1 %v2341_v41 }
 0x89b   :  { %2168 = vmatprep.subr.bf16.mxu1 %v2615_v1 }
 0x89e   :  { %2169 = vmatpush3.bf16.msra.mxu1 %v2342_v45  ;;  %v2000_v45 = vld [vmem:[%s3054_s18] ss:$0 sm:$0xff] }
 0x918   :  { %v1545_v26 = vpop.xlane.xlu1 %1544 }
 0x919   :  { %v1548_v27 = vmul.f32 0.0078125, %v1545_v26 }
 0x91a   :  { %v1547_v28 = vpop.xlane.xlu0 %1546 }
 0x91b   :  { %v1550_v29 = vsub.f32 %v1540_v22, %v1548_v27  ;;  %v1549_v32 = vmul.f32 0.0078125, %v1547_v28 }
 0x91d   :  { %v1551_v33 = vsub.f32 %v1541_v25, %v1549_v32  ;;  %v1552_v35 = vmul.f32 %v1550_v29, %v1550_v29  ;;  %v1991_v25 = vld [vmem:[%s3053_s17] ss:$0 sm:$0xff] }
 0x91f   :  { %1554 = vadd.xlane.f32.xlu1 %v1552_v35  ;;  %v1553_v36 = vmul.f32 %v1551_v33, %v1551_v33 }
 0x921   :  { %1556 = vadd.xlane.f32.xlu0 %v1553_v36 }
 0x9ac   :  { %v1555_v34 = vpop.xlane.xlu1 %1554 }
 0x9ad   :  { %v1558_v49 = vmul.f32 0.0078125, %v1555_v34 }
 0x9ae   :  { %v1557_v48 = vpop.xlane.xlu0 %1556 }
 0x9af   :  { %v1560_v30 = vadd.f32 1e-05, %v1558_v49  ;;  %v1559_v51 = vmul.f32 0.0078125, %v1557_v48  ;;  %v2001_v49 = vld [vmem:[%s3079_s3] ss:$0 sm:$0xff] }
 0x9b1   :  { %2379 = vrsqrt.f32 %v1560_v30  ;;  %v1561_v52 = vadd.f32 1e-05, %v1559_v51 }
 0x9b3   :  { %2381 = vrsqrt.f32 %v1561_v52 }
 0x9bb   :  { %v2380_v53 = vpop.eup %2379 }
 0x9bc   :  { %v1564_v57 = vmul.f32 %v2380_v53, %v1550_v29 }
 0x9bd   :  { %v2382_v58 = vpop.eup %2381 }
 0x9be   :  { %v1572_v62 = vmul.f32 %v1980_v54, %v1564_v57  ;;  %v1565_v63 = vmul.f32 %v2382_v58, %v1551_v33 }
 0x9c0   :  { %v1573_v2 = vmul.f32 %v1980_v54, %v1565_v63  ;;  %v1580_v42 = vadd.f32 %v1981_v61, %v1572_v62 }
 0x9c2   :  { %v1581_v31 = vadd.f32 %v1981_v61, %v1573_v2  ;;  %v1582_v3 = vpack.c.bf16 %v1580_v42, %v1580_v42 }
 0x9c4   :  { %v1583_v43 = vpack.c.bf16 %v1581_v31, %v1581_v31  ;;  %v1609_v4 = vunpack.c.l.b16 %v1582_v3 }
 0x9c6   :  { %v1610_v50 = vunpack.c.l.b16 %v1583_v43 }
 0x9c8   :  { %v1611_v0 = vrot.slane %v1610_v50, 7 }
 0x9ca   :  { %v1613_v5 = vsel %vm1612_vm3, %v1611_v0, %v1609_v4 }
 0x9cb   :  { %v1614_v46 = vpack.c.b16 %v1613_v5, %v1613_v5 }
 0x9cd   :  { %2171 = vmatmul.mubr.bf16.vlgmr.msra.gmra.mrb[28].mxu1 %v1614_v46 }
 0xaa0   :  { %v1698_v24 = vpop.f32.mrb[28].mxu1 }
 0xaa1   :  { %v1699_v10 = vadd.f32 %v1982_v9, %v1698_v24  ;;  %v2172_v11 = vpop.f32.mrb[29].mxu1 }
 0xaa2   :  { %v1701_v12 = vpop.f32.mrb[30].mxu1 }
 0xaa3   :  { %v1705_v13 = vmul.f32 0.044715, %v1699_v10  ;;  %v2173_v14 = vpop.f32.mrb[31].mxu1  ;;  %v1704_v20 = vmul.f32 0.5, %v1699_v10 }
 0xaa5   :  { %v1706_v15 = vmul.f32 %v1705_v13, %v1699_v10 }
 0xaa7   :  { %v1707_v16 = vmul.f32 %v1706_v15, %v1699_v10 }
 0xaa9   :  { %v1708_v17 = vadd.f32 %v1707_v16, %v1699_v10 }
 0xaab   :  { %v1709_v18 = vmul.f32 0.7978846, %v1708_v17 }
 0xaad   :  { %2383 = vtanh.f32 %v1709_v18 }
 0xab7   :  { %v2384_v19 = vpop.eup %2383 }
 0xab8   :  { %v1711_v21 = vadd.f32 1.0, %v2384_v19 }
 0xaba   :  { %v1712_v1 = vmul.f32 %v1711_v21, %v1704_v20 }
 0xabc   :  { %v1713_v22 = vpack.c.bf16 %v1712_v1, %v1712_v1 }
 0xabe   :  { %2191 = vmatmul.mubr.bf16.vlgmr.msra.gmra.mrb[16].mxu0 %v1713_v22 }
 0xb91   :  { %v1819_v26 = vpop.f32.mrb[16].mxu0 }
 0xb92   :  { %v1820_v27 = vadd.f32 %v1991_v25, %v1819_v26  ;;  %v2192_v28 = vpop.f32.mrb[17].mxu0 }
 0xb93   :  { %v1822_v29 = vpop.f32.mrb[18].mxu0 }
 0xb94   :  { %v2193_v32 = vpop.f32.mrb[19].mxu0  ;;  %v1825_v33 = vadd.f32 %v1820_v27, %v1699_v10 }
 0xb96   :  { %v1829_v35 = vsel %vm1828_vm4, %v1825_v33, 0.0 }
 0xb97   :  { %1830 = vadd.xlane.f32.xlu0 %v1829_v35 }
 0xc24   :  { %v1831_v36 = vpop.xlane.xlu0 %1830 }
 0xc25   :  { %v1832_v37 = vmul.f32 0.0078125, %v1831_v36 }
 0xc27   :  { %v1833_v38 = vsub.f32 %v1825_v33, %v1832_v37 }
 0xc29   :  { %v1834_v59 = vmul.f32 %v1833_v38, %v1833_v38 }
 0xc2b   :  { %v1835_v60 = vsel %vm1828_vm4, %v1834_v59, 0.0 }
 0xc2c   :  { %1836 = vadd.xlane.f32.xlu1 %v1835_v60 }
 0xcb9   :  { %v1837_v39 = vpop.xlane.xlu1 %1836 }
 0xcba   :  { %v1838_v40 = vmul.f32 0.0078125, %v1837_v39 }
 0xcbc   :  { %v1839_v41 = vadd.f32 1e-05, %v1838_v40 }
 0xcbe   :  { %2385 = vrsqrt.f32 %v1839_v41 }
 0xcc8   :  { %v2386_v44 = vpop.eup %2385 }
 0xcc9   :  { %v1841_v34 = vmul.f32 %v2386_v44, %v1833_v38 }
 0xccb   :  { %v1848_v48 = vmul.f32 %v2000_v45, %v1841_v34 }
 0xccd   :  { %v1855_v30 = vadd.f32 %v2001_v49, %v1848_v48 }
 0xccf   :  { %1856 = vst [vmem:[#allocation16] sm:$0x3] %v1855_v30 }
 0xcd0   :  { %2574 = shalt.err (!%p2571_p12)
}
 0xcd1   :  { %s3080_s16 = sld [smem:[#allocation29_spill]] }
 0xcd7   :  { %s2575_s2 = scalar_lea.hbm %s3080_s16, 32 }
 0xcd8   :  { %p2576_p13 = scmp.ne.s32.totalorder %s3080_s16, %s2575_s2  ;;  %p2579_p0 = scmp.lt.u32.totalorder %s2575_s2, %s3080_s16 }
 0xcda   :  { %p2581_p1 = pnand %p2579_p0, %p2576_p13 }
 0xcdc   :  { %2584 = shalt.err (!%p2581_p1)
}
 0xcdd   :  { %1866 = dma.vmem_to_hbm [thread:$0]  %s1864_s20, 32, %s3080_s16, [#allocation4]  }
 0xcde   :  { %2595 = dma.done.wait [#allocation4], 32  }
 0xcdf   :  { %2596 = vsyncadd [#allocation4], 4294967264 }
 0xce0   :  { %1870 = vsyncpa [#allocation3], 1 }
 0xce1   :  { %1871 = vsyncpa [#allocation6], 1 }
 0xce2   :  { %1872 = vsyncpa [#allocation9], 1 }
 0xce3   :  { %1873 = vsyncpa [#allocation12], 1 }
 0xce4   :  { %1874 = vsyncpa [#allocation15], 1 }
 0xce5   :  { %1875 = vsyncpa [#allocation4], 1 }

</bundles_post_ra>
